<compile_context>
chip_gen: v7x
topology: tpu7x:2x2x1
jax: 0.10.0
libtpu: 0.0.40
codegen_flags: <defaults>
</compile_context>

<pallas_src>
import functools
import math

import jax
import jax.numpy as jnp
from jax.experimental import pallas as pl
from jax.experimental.pallas import tpu as pltpu


def _attention_kernel(x_ref, wqkv_ref, wout_ref, bout_ref, o_ref, acc_ref, *,
                      dim_head, valid_len):
    """One (batch_tile, head) grid step of ViT attention."""
    h = pl.program_id(1)
    bt, n, d = x_ref.shape                       # n is the padded sequence length
    x_flat = x_ref[...].reshape(bt * n, d)       # leading-dim merge (layout-free)

    @pl.when(h == 0)
    def _init():
        acc_ref[...] = jnp.zeros_like(acc_ref)

    # Fused per-head QKV projection: one (D, 3*Dh)-wide matmul (scale for Q is
    # pre-folded into the weights on the host).  Output dtype follows the
    # inputs (bf16 MXU path when bf16 is fed); accumulation of the score / PV
    # / out-proj matmuls below is forced to f32.
    qkv = jnp.dot(x_flat, wqkv_ref[0])                          # (bt*n, 3*Dh)
    q = qkv[:, :dim_head].reshape(bt, n, dim_head)
    k = qkv[:, dim_head:2 * dim_head].reshape(bt, n, dim_head)
    v = qkv[:, 2 * dim_head:].reshape(bt, n, dim_head)

    # NT batched matmul: contracts the last axes, no explicit transpose.
    s = jnp.einsum("bqd,bkd->bqk", q, k,
                   preferred_element_type=jnp.float32)          # (bt, n, n) f32

    if n != valid_len:
        # Mask padded key columns (static trace-time condition).
        kmask = jax.lax.broadcasted_iota(jnp.int32, (1, 1, n), 2) < valid_len
        s = jnp.where(kmask, s, jnp.float32(-1e30))

    # Numerically-stable softmax; denominator via EUP approx reciprocal.
    s = s - jnp.max(s, axis=-1, keepdims=True)
    p = jnp.exp(s)
    p = p * pl.reciprocal(jnp.sum(p, axis=-1, keepdims=True), approx=True)

    o_h = jnp.einsum("bqk,bkd->bqd", p.astype(v.dtype), v,
                     preferred_element_type=jnp.float32)        # (bt, n, Dh)

    # Accumulate this head's output-projection contribution:
    #   sum_h (o_h @ w_out[h]) == concat_h(o_h) @ w_out
    acc_ref[...] += jnp.dot(o_h.reshape(bt * n, dim_head).astype(x_flat.dtype),
                            wout_ref[0], preferred_element_type=jnp.float32)

    @pl.when(h == pl.num_programs(1) - 1)
    def _finalize():
        out = acc_ref[...] + bout_ref[...]                      # bias added once
        o_ref[...] = out.reshape(bt, n, d).astype(o_ref.dtype)  # lane-dense store


def _default_vmem_limit_bytes():
    """Generation-aware VMEM limit: ~48 MiB on v7x, ~96 MiB on v5e/v6e."""
    try:
        cap = int(pltpu.get_tpu_info().vmem_capacity_bytes)
        return min((cap * 3) // 4, 100 * 1024 * 1024)
    except Exception:
        return 64 * 1024 * 1024


def scaled_dot_product_attention_block(x, w_qkv, w_out, b_out, *, heads, dim_head,
                                       batch_tile=None, seq_pad_multiple=128,
                                       compute_dtype=None, vmem_limit_bytes=None):
    """x: (B, N, D) -> (B, N, D).  Eval mode (no dropout)."""
    B, N, D = x.shape
    hd = heads * dim_head
    assert w_qkv.shape == (D, 3 * hd)
    assert w_out.shape == (hd, D)

    cdtype = jnp.dtype(compute_dtype) if compute_dtype is not None else x.dtype

    # Batch tile: prefer >=2 grid steps along the parallel batch axis.
    if batch_tile is None:
        bt = B // 2 if (B % 2 == 0 and B >= 2) else B
    else:
        bt = batch_tile
    assert B % bt == 0, "batch_tile must divide B"

    # Pad N to a lane-dense multiple (masked in-kernel, sliced off below).
    n_pad = ((N + seq_pad_multiple - 1) // seq_pad_multiple) * seq_pad_multiple

    # Host-side weight prep (once): head-major fused QKV slab (H, D, 3*Dh)
    # with the 1/sqrt(Dh) scale folded into the Q third.
    scale = dim_head ** (-0.5)
    w3 = w_qkv.astype(jnp.float32).reshape(D, 3, heads, dim_head)
    w3 = w3 * jnp.asarray([scale, 1.0, 1.0], jnp.float32)[None, :, None, None]
    w_qkv_hm = jnp.transpose(w3, (2, 0, 1, 3)).reshape(heads, D, 3 * dim_head)
    w_qkv_hm = w_qkv_hm.astype(cdtype)
    w_out_hm = w_out.reshape(heads, dim_head, D).astype(cdtype)     # (H, Dh, D)
    b_out2d = b_out.reshape(1, D).astype(jnp.float32)

    xp = x.astype(cdtype)
    if n_pad != N:
        xp = jnp.pad(xp, ((0, 0), (0, n_pad - N), (0, 0)))

    if vmem_limit_bytes is None:
        vmem_limit_bytes = _default_vmem_limit_bytes()

    kernel = functools.partial(_attention_kernel, dim_head=dim_head, valid_len=N)

    out_padded = pl.pallas_call(
        kernel,
        out_shape=jax.ShapeDtypeStruct((B, n_pad, D), x.dtype),
        grid_spec=pltpu.PrefetchScalarGridSpec(
            num_scalar_prefetch=0,
            grid=(B // bt, heads),
            in_specs=[
                # x block: head-invariant index -> stays resident across heads.
                pl.BlockSpec((bt, n_pad, D), lambda i, h: (i, 0, 0)),
                # Per-head fused QKV weights: only one head resident at a time.
                pl.BlockSpec((1, D, 3 * dim_head), lambda i, h: (h, 0, 0)),
                # Per-head output-projection weights.
                pl.BlockSpec((1, dim_head, D), lambda i, h: (h, 0, 0)),
                # Bias (grid-invariant, tiny).
                pl.BlockSpec((1, D), lambda i, h: (0, 0)),
            ],
            out_specs=pl.BlockSpec((bt, n_pad, D), lambda i, h: (i, 0, 0)),
            scratch_shapes=[pltpu.VMEM((bt * n_pad, D), jnp.float32)],
        ),
        compiler_params=pltpu.CompilerParams(
            dimension_semantics=("parallel", "arbitrary"),
            vmem_limit_bytes=vmem_limit_bytes),
    )(xp, w_qkv_hm, w_out_hm, b_out2d)

    return out_padded[:, :N, :]


def _reference(x, w_qkv, w_out, b_out, *, heads, dim_head):
    """Pure-JAX reference mirroring the PyTorch forward (eval mode)."""
    B, N, D = x.shape
    hd = heads * dim_head
    qkv = jnp.einsum("bnd,de->bne", x, w_qkv)
    q, k, v = jnp.split(qkv, 3, axis=-1)

    def to_heads(t):   # (B, N, H*Dh) -> (B, H, N, Dh)
        return t.reshape(B, N, heads, dim_head).transpose(0, 2, 1, 3)

    q, k, v = map(to_heads, (q, k, v))
    s = jnp.einsum("bhqd,bhkd->bhqk", q, k) * (dim_head ** -0.5)
    p = jax.nn.softmax(s, axis=-1)
    o = jnp.einsum("bhqk,bhkd->bhqd", p, v)
    o = o.transpose(0, 2, 1, 3).reshape(B, N, hd)
    return jnp.einsum("bne,ed->bnd", o, w_out) + b_out


if __name__ == "__main__":
    # Small shapes consistent with the module: dim=32, heads=4, dim_head=8.
    # (Note: at these demo sizes the kernel is overhead/padding dominated —
    #  do not draw tuning conclusions here; it pays off at real ViT sizes.)
    B, N, DIM = 2, 8, 32
    HEADS, DIM_HEAD = 4, 8
    HD = HEADS * DIM_HEAD

    key = jax.random.PRNGKey(0)
    kx, kqkv, kwo, kbo = jax.random.split(key, 4)

    x = jax.random.normal(kx, (B, N, DIM), dtype=jnp.float32)

    # Deterministic parameter init (torch-Linear-style uniform bounds).
    qkv_bound = 1.0 / math.sqrt(DIM)
    out_bound = 1.0 / math.sqrt(HD)
    w_qkv = jax.random.uniform(kqkv, (DIM, 3 * HD), minval=-qkv_bound,
                               maxval=qkv_bound, dtype=jnp.float32)
    w_out = jax.random.uniform(kwo, (HD, DIM), minval=-out_bound,
                               maxval=out_bound, dtype=jnp.float32)
    b_out = jax.random.uniform(kbo, (DIM,), minval=-out_bound,
                               maxval=out_bound, dtype=jnp.float32)

    ref = _reference(x, w_qkv, w_out, b_out, heads=HEADS, dim_head=DIM_HEAD)

    # Default (f32 compute) path.
    out = scaled_dot_product_attention_block(
        x, w_qkv, w_out, b_out, heads=HEADS, dim_head=DIM_HEAD)
    out = jax.block_until_ready(out)
    assert out.shape == (B, N, DIM)
    # approx reciprocal (EUP) changes results at the ~1e-3 level vs. the
    # exact-f32 reference; structural bugs would be O(0.1+).
    assert jnp.allclose(out, ref, atol=1e-2, rtol=1e-2), "f32 mismatch vs reference"

    # bf16 compute path (production recommendation): same structure, bf16
    # activations/weights with f32 accumulation; loose tolerance.
    out_bf16 = scaled_dot_product_attention_block(
        x, w_qkv, w_out, b_out, heads=HEADS, dim_head=DIM_HEAD,
        compute_dtype=jnp.bfloat16)
    out_bf16 = jax.block_until_ready(out_bf16)
    assert jnp.allclose(out_bf16, ref, atol=1e-1, rtol=1e-1), "bf16 mismatch vs reference"

    print("KERNEL_OK")
</pallas_src>

<mosaic_0001>
module attributes {stable_mosaic.version = 11 : i64} {
  func.func @_attention_kernel(%arg0: i32, %arg1: i32, %arg2: memref<1x128x32xf32, #tpu.memory_space<vmem>>, %arg3: memref<1x32x24xf32, #tpu.memory_space<vmem>>, %arg4: memref<1x8x32xf32, #tpu.memory_space<vmem>>, %arg5: memref<1x32xf32, #tpu.memory_space<vmem>>, %arg6: memref<1x128x32xf32, #tpu.memory_space<vmem>>, %arg7: memref<128x32xf32, #tpu.memory_space<vmem>>) attributes {dimension_semantics = [#tpu.dimension_semantics<parallel>, #tpu.dimension_semantics<arbitrary>], iteration_bounds = array<i64: 2, 4>, scalar_prefetch = 0 : i64, scratch_operands = 1 : i64, tpu.core_type = #tpu.core_type<tc>, window_params = [{transform_indices = @transform_0, window_bounds = array<i64: 1, 128, 32>}, {transform_indices = @transform_1, window_bounds = array<i64: 1, 32, 24>}, {transform_indices = @transform_2, window_bounds = array<i64: 1, 8, 32>}, {pipeline_mode = #tpu.pipeline_mode<synchronous>, transform_indices = @transform_3, window_bounds = array<i64: 1, 32>}, {transform_indices = @transform_4, window_bounds = array<i64: 1, 128, 32>}]} {
    %c0 = arith.constant 0 : index
    %c0_0 = arith.constant 0 : index
    %c0_1 = arith.constant 0 : index
    %0 = vector.load %arg2[%c0, %c0_0, %c0_1] : memref<1x128x32xf32, #tpu.memory_space<vmem>>, vector<1x128x32xf32>
    %1 = vector.shape_cast %0 : vector<1x128x32xf32> to vector<128x32xf32>
    %c0_i32 = arith.constant 0 : i32
    %2 = arith.cmpi eq, %arg1, %c0_i32 : i32
    %3 = arith.extui %2 : i1 to i32
    %c0_i32_2 = arith.constant 0 : i32
    %4 = arith.cmpi ne, %3, %c0_i32_2 : i32
    scf.if %4 {
      %cst_20 = arith.constant 0.000000e+00 : f32
      %43 = vector.broadcast %cst_20 : f32 to vector<128x32xf32>
      %c0_21 = arith.constant 0 : index
      %c0_22 = arith.constant 0 : index
      %44 = vector.load %arg7[%c0_21, %c0_22] : memref<128x32xf32, #tpu.memory_space<vmem>>, vector<128x32xf32>
      tpu.vector_store %arg7[%c0_21, %c0_22], %43 {strides = array<i32>} : memref<128x32xf32, #tpu.memory_space<vmem>>, vector<128x32xf32>,
    } else {
    }
    %c0_3 = arith.constant 0 : index
    %c0_4 = arith.constant 0 : index
    %c0_5 = arith.constant 0 : index
    %5 = vector.load %arg3[%c0_3, %c0_4, %c0_5] : memref<1x32x24xf32, #tpu.memory_space<vmem>>, vector<1x32x24xf32>
    %6 = vector.shape_cast %5 : vector<1x32x24xf32> to vector<32x24xf32>
    %cst = arith.constant dense<0.000000e+00> : vector<128x24xf32>
    %7 = tpu.matmul %1, %6, %cst {dimension_numbers = #tpu.dot_dimension_numbers<[1], [0], [0], [1], [0, 0, 1, 1], [], []>} : vector<128x32xf32>, vector<32x24xf32>, vector<128x24xf32> -> vector<128x24xf32>
    %8 = vector.extract_strided_slice %7 {offsets = [0, 0], sizes = [128, 8], strides = [1, 1]} : vector<128x24xf32> to vector<128x8xf32>
    %9 = vector.shape_cast %8 : vector<128x8xf32> to vector<1x128x8xf32>
    %10 = vector.extract_strided_slice %7 {offsets = [0, 8], sizes = [128, 8], strides = [1, 1]} : vector<128x24xf32> to vector<128x8xf32>
    %11 = vector.shape_cast %10 : vector<128x8xf32> to vector<1x128x8xf32>
    %12 = vector.extract_strided_slice %7 {offsets = [0, 16], sizes = [128, 8], strides = [1, 1]} : vector<128x24xf32> to vector<128x8xf32>
    %13 = vector.shape_cast %12 : vector<128x8xf32> to vector<1x128x8xf32>
    "tpu.trace_start"() <{level = 10 : i32, message = "bqd,bkd->bqk"}> : () -> ()
    %cst_6 = arith.constant dense<0.000000e+00> : vector<1x128x128xf32>
    %14 = tpu.matmul %9, %11, %cst_6 {dimension_numbers = #tpu.dot_dimension_numbers<[2], [2], [1], [1], [0, 0, 0, 1, 1, 1], [0], [0]>} : vector<1x128x8xf32>, vector<1x128x8xf32>, vector<1x128x128xf32> -> vector<1x128x128xf32>
    "tpu.trace_stop"() : () -> ()
    %15 = tpu.iota {dimensions = array<i32: 2>} : vector<1x1x128xi32>
    %c8_i32 = arith.constant 8 : i32
    %16 = vector.broadcast %c8_i32 : i32 to vector<1x1x128xi32>
    %17 = arith.cmpi slt, %15, %16 : vector<1x1x128xi32>
    %cst_7 = arith.constant -1.000000e+30 : f32
    %18 = vector.shape_cast %17 : vector<1x1x128xi1> to vector<1x1x128xi1>
    %19 = vector.broadcast %18 : vector<1x1x128xi1> to vector<1x128x128xi1>
    %20 = vector.broadcast %cst_7 : f32 to vector<1x128x128xf32>
    %21 = arith.select %19, %14, %20 : vector<1x128x128xi1>, vector<1x128x128xf32>
    %cst_8 = arith.constant dense<0xFF800000> : vector<1x128xf32>
    %22 = vector.multi_reduction <maximumf>, %21, %cst_8 [2] : vector<1x128x128xf32> to vector<1x128xf32>
    %23 = vector.shape_cast %22 : vector<1x128xf32> to vector<1x128x1xf32>
    %24 = vector.broadcast %23 : vector<1x128x1xf32> to vector<1x128x128xf32>
    %25 = arith.subf %21, %24 : vector<1x128x128xf32>
    %26 = math.exp %25 : vector<1x128x128xf32>
    %cst_9 = arith.constant dense<0.000000e+00> : vector<1x128xf32>
    %27 = vector.multi_reduction <add>, %26, %cst_9 [2] : vector<1x128x128xf32> to vector<1x128xf32>
    %28 = vector.shape_cast %27 : vector<1x128xf32> to vector<1x128x1xf32>
    %29 = tpu.reciprocal %28 {approx = true} : vector<1x128x1xf32> -> vector<1x128x1xf32>
    %30 = vector.broadcast %29 : vector<1x128x1xf32> to vector<1x128x128xf32>
    %31 = arith.mulf %26, %30 : vector<1x128x128xf32>
    "tpu.trace_start"() <{level = 10 : i32, message = "bqk,bkd->bqd"}> : () -> ()
    %cst_10 = arith.constant dense<0.000000e+00> : vector<1x128x8xf32>
    %32 = tpu.matmul %31, %13, %cst_10 {dimension_numbers = #tpu.dot_dimension_numbers<[2], [1], [1], [2], [0, 0, 0, 1, 1, 2], [0], [0]>} : vector<1x128x128xf32>, vector<1x128x8xf32>, vector<1x128x8xf32> -> vector<1x128x8xf32>
    "tpu.trace_stop"() : () -> ()
    %c0_11 = arith.constant 0 : index
    %c0_12 = arith.constant 0 : index
    %33 = vector.load %arg7[%c0_11, %c0_12] : memref<128x32xf32, #tpu.memory_space<vmem>>, vector<128x32xf32>
    %34 = vector.shape_cast %32 : vector<1x128x8xf32> to vector<128x8xf32>
    %c0_13 = arith.constant 0 : index
    %c0_14 = arith.constant 0 : index
    %c0_15 = arith.constant 0 : index
    %35 = vector.load %arg4[%c0_13, %c0_14, %c0_15] : memref<1x8x32xf32, #tpu.memory_space<vmem>>, vector<1x8x32xf32>
    %36 = vector.shape_cast %35 : vector<1x8x32xf32> to vector<8x32xf32>
    %cst_16 = arith.constant dense<0.000000e+00> : vector<128x32xf32>
    %37 = tpu.matmul %34, %36, %cst_16 {dimension_numbers = #tpu.dot_dimension_numbers<[1], [0], [0], [1], [0, 0, 1, 1], [], []>} : vector<128x8xf32>, vector<8x32xf32>, vector<128x32xf32> -> vector<128x32xf32>
    %38 = arith.addf %33, %37 : vector<128x32xf32>
    %c0_17 = arith.constant 0 : index
    %c0_18 = arith.constant 0 : index
    %39 = vector.load %arg7[%c0_17, %c0_18] : memref<128x32xf32, #tpu.memory_space<vmem>>, vector<128x32xf32>
    tpu.vector_store %arg7[%c0_17, %c0_18], %38 {strides = array<i32>} : memref<128x32xf32, #tpu.memory_space<vmem>>, vector<128x32xf32>,
    %c3_i32 = arith.constant 3 : i32
    %40 = arith.cmpi eq, %arg1, %c3_i32 : i32
    %41 = arith.extui %40 : i1 to i32
    %c0_i32_19 = arith.constant 0 : i32
    %42 = arith.cmpi ne, %41, %c0_i32_19 : i32
    scf.if %42 {
      %c0_20 = arith.constant 0 : index
      %c0_21 = arith.constant 0 : index
      %43 = vector.load %arg7[%c0_20, %c0_21] : memref<128x32xf32, #tpu.memory_space<vmem>>, vector<128x32xf32>
      %c0_22 = arith.constant 0 : index
      %c0_23 = arith.constant 0 : index
      %44 = vector.load %arg5[%c0_22, %c0_23] : memref<1x32xf32, #tpu.memory_space<vmem>>, vector<1x32xf32>
      %45 = vector.broadcast %44 : vector<1x32xf32> to vector<128x32xf32>
      %46 = arith.addf %43, %45 : vector<128x32xf32>
      %47 = vector.shape_cast %46 : vector<128x32xf32> to vector<1x128x32xf32>
      %c0_24 = arith.constant 0 : index
      %c0_25 = arith.constant 0 : index
      %c0_26 = arith.constant 0 : index
      %48 = vector.load %arg6[%c0_24, %c0_25, %c0_26] : memref<1x128x32xf32, #tpu.memory_space<vmem>>, vector<1x128x32xf32>
      tpu.vector_store %arg6[%c0_24, %c0_25, %c0_26], %47 {strides = array<i32>} : memref<1x128x32xf32, #tpu.memory_space<vmem>>, vector<1x128x32xf32>,
    } else {
    }
    return
  }
  func.func @transform_0(%arg0: i32, %arg1: i32) -> (i32, i32, i32) {
    %c0_i32 = arith.constant 0 : i32
    %c0_i32_0 = arith.constant 0 : i32
    %c0_i32_1 = arith.constant 0 : i32
    return %arg0, %c0_i32, %c0_i32_0 : i32, i32, i32
  }
  func.func @transform_1(%arg0: i32, %arg1: i32) -> (i32, i32, i32) {
    %c0_i32 = arith.constant 0 : i32
    %c0_i32_0 = arith.constant 0 : i32
    %c0_i32_1 = arith.constant 0 : i32
    return %arg1, %c0_i32, %c0_i32_0 : i32, i32, i32
  }
  func.func @transform_2(%arg0: i32, %arg1: i32) -> (i32, i32, i32) {
    %c0_i32 = arith.constant 0 : i32
    %c0_i32_0 = arith.constant 0 : i32
    %c0_i32_1 = arith.constant 0 : i32
    return %arg1, %c0_i32, %c0_i32_0 : i32, i32, i32
  }
  func.func @transform_3(%arg0: i32, %arg1: i32) -> (i32, i32) {
    %c0_i32 = arith.constant 0 : i32
    %c0_i32_0 = arith.constant 0 : i32
    %c0_i32_1 = arith.constant 0 : i32
    return %c0_i32, %c0_i32_0 : i32, i32
  }
  func.func @transform_4(%arg0: i32, %arg1: i32) -> (i32, i32, i32) {
    %c0_i32 = arith.constant 0 : i32
    %c0_i32_0 = arith.constant 0 : i32
    %c0_i32_1 = arith.constant 0 : i32
    return %arg0, %c0_i32, %c0_i32_0 : i32, i32, i32
  }
}

</mosaic_0001>

<bundles_post_ra>
// kernel: tpu_custom_call.1
= control target key start
LH: loop header
LB: loop body
LE: loop exit
PB: predicated region body
PF: predicated region fallthrough
CT: control target
= control target key end

     0   :  { %s3413_s0 = inlined_call_operand.hbm [shape: f32[2,128,32], index: 0, kind: input, shape index: {}]   ;;  %s3414_s1 = inlined_call_operand.hbm [shape: f32[4,32,24], index: 1, kind: input, shape index: {}]   ;;  %s3415_s2 = inlined_call_operand.hbm [shape: f32[4,8,32], index: 2, kind: input, shape index: {}]   ;;  %s3416_s3 = inlined_call_operand.hbm [shape: f32[1,32], index: 3, kind: input, shape index: {}]   ;;  %s3417_s4 = inlined_call_operand.hbm [shape: f32[2,128,32], index: 4, kind: output, shape index: {}]  }
   0x1   :  { %3437 = sst [smem:[#allocation22_spill]] %s3414_s1 }
   0x2   :  { %3438 = sst [smem:[#allocation23_spill]] %s3416_s3 }
   0x3   :  { %3439 = sst [smem:[#allocation24_spill]] %s3417_s4 }
   0x4   :  { %9 = vsyncpa [#allocation4], 0 }
   0x5   :  { %11 = vsyncpa [#allocation4 + $0x1], 0 }
   0x6   :  { %12 = vsyncpa [#allocation7], 0 }
   0x7   :  { %14 = vsyncpa [#allocation7 + $0x1], 0 }
   0x8   :  { %15 = vsyncpa [#allocation10], 0 }
   0x9   :  { %16 = vsyncpa [#allocation5], 0 }
   0xa   :  { %18 = vsyncpa [#allocation5 + $0x1], 0  ;;  %s2648_s15 = smov 0   ;;  %s2650_s16 = smov 0  }
   0xb   :  { %s2652_s17 = smov 0   ;;  %s2654_s18 = smov 0  }
   0xc   :  { %s2656_s19 = smov 0   ;;  %s2658_s20 = smov 0  }
   0xd   :  { %s2660_s21 = smov 0   ;;  %s2662_s22 = smov 0  }
   0xe   :  { %s2664_s23 = smov 0   ;;  %s2666_s24 = smov 0  }
   0xf   :  { %s2668_s25 = smov 0  }
  0x10 LB: > { %3440 = sst [smem:[#allocation16_spill]] %s2581_s18  ;;  %s33_s26 = sadd.s32 1, %s2601_s23  ;;  %s2609_s25 = sphi %s2668_s25, %s24_s25   ;;  %s2605_s24 = sphi %s2666_s24, %s3488_s24   ;;  %s2601_s23 = sphi %s2664_s23, %s3496_s23   ;;  %s2597_s22 = sphi %s2662_s22, %s3486_s22   ;;  %s2593_s21 = sphi %s2660_s21, %s3495_s21   ;;  %s2589_s20 = sphi %s2658_s20, %s3494_s20   ;;  %s2585_s19 = sphi %s2656_s19, %s3493_s19   ;;  %s2581_s18 = sphi %s2654_s18, %s3492_s18   ;;  %s2577_s17 = sphi %s2652_s17, %s3491_s17   ;;  %s2573_s16 = sphi %s2650_s16, %s3490_s16   ;;  %s2569_s15 = sphi %s2648_s15, %s3489_s15  }
  0x11   : > { %3441 = sst [smem:[#allocation17_spill]] %s2605_s24  ;;  %p3419_p0 = scmp.eq.s32.totalorder %s2609_s25, 0 }
  0x12   : > { %p2705_p1 = scmp.ge.s32.totalorder %s33_s26, 4  ;;  %s69_s28 = sadd.s32 1, %s2577_s17 }
  0x13   : > { %p76_p2 = scmp.ne.s32.totalorder %s2577_s17, %s2573_s16  ;;  %p3418_p4 = scmp.lt.s32.totalorder %s2609_s25, 8 }
  0x14   : > { %s3498_s26 = smov (%p2705_p1, %s33_s26), 0  ;;  %s211_s5 = sand.u32 1, %s2609_s25  }
  0x15   : > { %3443 = sst [smem:[#allocation18_spill]] %s3498_s26  ;;  %p2718_p3 = por %p76_p2, %p3419_p0 }
  0x16   : > { %s66_s30 = ssub.s32 %s2601_s23, %s3498_s26  ;;  %s3425_s6 = sand.u32 1, %s2577_s17  }
  0x17   : > { %p67_p5 = scmp.eq.s32.totalorder %s66_s30, 0  ;;  %s1626_s8 = sshll.u32 %s3425_s6, 5 }
  0x18   : > { %s1710_s9 = sshll.u32 %s2601_s23, 9  ;;  %s3446_s1 = sld [smem:[#allocation22_spill]] }
  0x19   : > { %s2728_s7 = scalar_select %p67_p5, %s2577_s17, %s69_s28  }
  0x1a   : > { %s215_s13 = scalar_lea.vmem [#allocation6], %s1626_s8  ;;  %p2744_p6 = pnand %p3418_p4, %p2718_p3 }
  0x1b   : > { %3445 = sst [smem:[#allocation19_spill]] %s2728_s7  ;;  %s222_s14 = sshll.u32 %s215_s13, 4  ;;  %s2738_s14 = int_to_ptr.vmem [resolvable:$true] %s222_s14 }
  0x1c   : > { %s3447_s28 = scalar_select %p2744_p6, 1, 0 }
  0x1d   : > { %s2748_s30 = scalar_lea.sflag [#allocation7], %s211_s5  ;;  %p3420_p8 = pneg %p2744_p6 }
  0x1e   : > { %s2736_s12 = scalar_lea.hbm %s3446_s1, %s1710_s9  ;;  %s2366_s29 = scalar_lea.hbm %s3446_s1, 2048 }
  0x1f   : > { %s2361_s9 = scalar_lea.hbm %s2736_s12, 512  ;;  %p2367_p11 = scmp.lt.u32.totalorder %s2736_s12, %s3446_s1 }
  0x20   : > { %p2362_p7 = scmp.ne.s32.totalorder %s2736_s12, %s2361_s9  ;;  %p2368_p12 = scmp.lt.u32.totalorder %s2366_s29, %s2361_s9 }
  0x21   : > { %p2370_p2 = scmp.lt.u32.totalorder %s2361_s9, %s2736_s12 }
  0x22   : > { %p2364_p9 = pnand %p3420_p8, %p2362_p7  ;;  %p2369_p13 = por %p2368_p12, %p2367_p11 }
  0x24   : > { %p2365_p10 = pneg %p2364_p9  ;;  %p2371_p3 = por %p2370_p2, %p2369_p13 }
  0x26   : > { %p2372_p5 = pnand %p2371_p3, %p2365_p10 }
  0x28   : > { %2375 = shalt.err (!%p2372_p5)
}
  0x29   : > { %s2376_s5 = scalar_lea.vmem %s2738_s14, 512  ;;  %s2611_s8 = smov [#allocation6]  }
  0x2a   : > { %p2377_p7 = scmp.ne.s32.totalorder %s2738_s14, %s2376_s5  ;;  %s2381_s10 = sshll.u32 %s2611_s8, 4  ;;  %s2382_s10 = int_to_ptr.vmem [resolvable:$false] %s2381_s10 }
  0x2b   : > { %s2383_s11 = scalar_lea.vmem %s2382_s10, 1024  ;;  %p2384_p0 = scmp.lt.s32.totalorder %s2738_s14, %s2382_s10 }
  0x2c   : > { %p2379_p9 = pnand %p2377_p7, %p3420_p8  ;;  %p2385_p11 = scmp.lt.s32.totalorder %s2383_s11, %s2376_s5 }
  0x2e   : > { %p2380_p4 = pneg %p2379_p9  ;;  %p2386_p12 = por %p2385_p11, %p2384_p0 }
  0x30   : > { %p2387_p13 = pnand %p2386_p12, %p2380_p4 }
  0x32   : > { %2390 = shalt.err (!%p2387_p13)
}
  0x33   : > { %s3423_s9 = smov 128   ;;  %s3424_s29 = smov 8  }
  0x34   : > { %2109 = dma.hbm_to_vmem [thread:$0]  (!%p2744_p6), %s2736_s12, 512, %s2738_s14, %s2748_s30, %s3423_s9, %s3423_s9, %s3424_s29  }
  0x35   : > { %s2780_s13 = sadd.s32 4294967295, %s2609_s25   ;;  %s1619_s5 = sadd.s32 4294967294, %s2609_s25  }
  0x36   : > { %p50_p0 = scmp.ne.s32.totalorder %s2589_s20, %s2585_s19  ;;  %p56_p4 = scmp.ne.s32.totalorder %s2585_s19, %s2581_s18 }
  0x37   : > { %p3430_p10 = scmp.eq.s32.totalorder %s2780_s13, 0  ;;  %p82_p2 = scmp.ne.s32.totalorder %s2573_s16, %s2569_s15 }
  0x38   : > { %p3448_p3 = scmp.eq.s32.totalorder %s2609_s25, 0  ;;  %p153_p7 = scmp.eq.s32.totalorder %s2780_s13, 7 }
  0x39   : > { %p2800_p9 = por %p3430_p10, %p56_p4  ;;  %p2806_p11 = por %p82_p2, %p3430_p10 }
  0x3a   : > { %p2793_p5 = por %p3448_p3, %p50_p0  ;;  %p2810_p12 = por %p153_p7, %p50_p0 }
  0x3b   : > { %s3450_s12 = scalar_select %p2800_p9, 1, 0 }
  0x3c   : > { %s3449_s10 = scalar_select %p2793_p5, 1, 0 }
  0x3d   : > { %s3451_s14 = scalar_select %p2806_p11, 1, 0 }
  0x3e   : > { %s3452_s15 = scalar_select %p2810_p12, 1, 0 }
  0x3f   : > { %p159_p13 = scmp.eq.s32.totalorder %s1619_s5, 7  ;;  %p1620_p3 = scmp.ge.s32.totalorder %s2609_s25, 1 }
  0x40   : > { %p166_p8 = scmp.lt.s32.totalorder %s2609_s25, 9  ;;  %s2614_s29 = smov [#allocation9]  }
  0x41   : > { %p2816_p6 = por %p159_p13, %p56_p4  ;;  %s179_s8 = sshll.u32 %s2614_s29, 4  ;;  %s180_s8 = int_to_ptr.vmem [resolvable:$true] %s179_s8 }
  0x42   : > { %p2820_p5 = pnand %p1620_p3, %p166_p8  ;;  %s36_s1 = sadd.s32 1, %s2605_s24 }
  0x43   : > { %s3453_s11 = scalar_select %p2816_p6, 1, 0 }
  0x44   : > { %s3455_s9 = scalar_select %p2820_p5, 1, 0 }
  0x45   : > { %3454 = sst [smem:[#allocation20_spill]] %s3453_s11  ;;  %p2099_p2 = pneg %p2820_p5 }
  0x46   : > { %s3500_s1 = smov (!%p2705_p1, %s36_s1), %s2605_s24  ;;  %s3457_s3 = sld [smem:[#allocation23_spill]] }
  0x47   : > { %p2829_p0 = pnand %p2099_p2, %p3430_p10 }
  0x49   : > { %p2393_p4 = pneg %p2829_p0 }
  0x4c   : > { %s2391_s11 = scalar_lea.hbm %s3457_s3, 16 }
  0x4d   : > { %p2392_p8 = scmp.ne.s32.totalorder %s3457_s3, %s2391_s11  ;;  %p2398_p3 = scmp.lt.u32.totalorder %s2391_s11, %s3457_s3 }
  0x4f   : > { %p2394_p7 = pnand %p2393_p4, %p2392_p8 }
  0x51   : > { %p2395_p13 = pneg %p2394_p7 }
  0x53   : > { %p2400_p2 = pnand %p2398_p3, %p2395_p13 }
  0x55   : > { %2403 = shalt.err (!%p2400_p2)
}
  0x56   : > { %s2404_s27 = scalar_lea.vmem %s180_s8, 16  ;;  %s2411_s26 = scalar_lea.vmem %s180_s8, 32 }
  0x57   : > { %p2405_p1 = scmp.ne.s32.totalorder %s180_s8, %s2404_s27  ;;  %p2412_p12 = scmp.lt.s32.totalorder %s180_s8, %s180_s8 }
  0x58   : > { %p2413_p11 = scmp.lt.s32.totalorder %s2411_s26, %s2404_s27 }
  0x59   : > { %p2407_p10 = pnand %p2405_p1, %p2393_p4 }
  0x5a   : > { %p2414_p9 = por %p2413_p11, %p2412_p12 }
  0x5b   : > { %p2408_p6 = pneg %p2407_p10 }
  0x5d   : > { %p2415_p5 = pnand %p2414_p9, %p2408_p6 }
  0x5f   : > { %2418 = shalt.err (!%p2415_p5)
}
  0x60   : > { %2102 = dma.hbm_to_vmem [thread:$0]  (!%p2829_p0), %s3457_s3, 16, %s180_s8, [#allocation10]  }
  0x61   : > { %p38_p10 = scmp.ge.s32.totalorder %s3500_s1, 2  ;;  %s3458_s6 = sand.u32 1, %s2589_s20  }
  0x62   : > { %s1623_s7 = sshll.u32 %s3458_s6, 7  ;;  %s1709_s11 = sshll.u32 %s2605_s24, 11 }
  0x63   : > { %s3502_s1 = smov (%p38_p10, %s3500_s1), 0  ;;  %s2861_s27 = scalar_lea.hbm %s3413_s0, %s1709_s11 }
  0x64   : > { %3459 = sst [smem:[#allocation21_spill]] %s3502_s1  ;;  %s194_s26 = scalar_lea.vmem [#allocation3], %s1623_s7 }
  0x65   : > { %s201_s4 = sshll.u32 %s194_s26, 4  ;;  %s40_s18 = ssub.s32 %s2605_s24, %s3502_s1  ;;  %s2865_s4 = int_to_ptr.vmem [resolvable:$true] %s201_s4 }
  0x66   : > { %p41_p6 = scmp.eq.s32.totalorder %s40_s18, 0  ;;  %p3460_p5 = scmp.ne.s32.totalorder %s3449_s10, 0 }
  0x67   : > { %p3461_p9 = scmp.lt.s32.totalorder %s2609_s25, 8  ;;  %s3463_s6 = sand.u32 1, %s2577_s17  }
  0x68   : > { %s2877_s11 = sshll.u32 %s3463_s6, 3  ;;  %s3464_s7 = sadd.s32 1, %s2589_s20 }
  0x69   : > { %p2871_p11 = pnand %p3461_p9, %p3460_p5  ;;  %s3465_s26 = sand.u32 1, %s2589_s20  }
  0x6a   : > { %s2883_s29 = scalar_select %p41_p6, %s2589_s20, %s3464_s7  }
  0x6b   : > { %s2887_s3 = scalar_lea.sflag [#allocation4], %s3465_s26  ;;  %s2419_s1 = scalar_lea.hbm %s2861_s27, 2048 }
  0x6c   : > { %p2420_p12 = scmp.ne.s32.totalorder %s2861_s27, %s2419_s1  ;;  %p2421_p0 = pneg %p2871_p11 }
  0x6d   : > { %s2424_s6 = scalar_lea.hbm %s3413_s0, 4096  ;;  %p2425_p7 = scmp.lt.u32.totalorder %s2861_s27, %s3413_s0 }
  0x6e   : > { %p2422_p8 = pnand %p2421_p0, %p2420_p12  ;;  %p2426_p13 = scmp.lt.u32.totalorder %s2424_s6, %s2419_s1 }
  0x6f   : > { %p2428_p2 = scmp.lt.u32.totalorder %s2419_s1, %s2861_s27 }
  0x70   : > { %p2423_p4 = pneg %p2422_p8  ;;  %p2427_p3 = por %p2426_p13, %p2425_p7 }
  0x72   : > { %p2429_p1 = por %p2428_p2, %p2427_p3 }
  0x74   : > { %p2430_p10 = pnand %p2429_p1, %p2423_p4 }
  0x76   : > { %2433 = shalt.err (!%p2430_p10)
}
  0x77   : > { %s2434_s7 = scalar_lea.vmem %s2865_s4, 2048  ;;  %s2615_s26 = smov [#allocation3]  }
  0x78   : > { %p2435_p6 = scmp.ne.s32.totalorder %s2865_s4, %s2434_s7  ;;  %s2439_s10 = sshll.u32 %s2615_s26, 4  ;;  %s2440_s10 = int_to_ptr.vmem [resolvable:$false] %s2439_s10 }
  0x79   : > { %s2441_s24 = scalar_lea.vmem %s2440_s10, 4096  ;;  %p2442_p12 = scmp.lt.s32.totalorder %s2865_s4, %s2440_s10 }
  0x7a   : > { %p2437_p5 = pnand %p2435_p6, %p2421_p0  ;;  %p2443_p8 = scmp.lt.s32.totalorder %s2441_s24, %s2434_s7 }
  0x7c   : > { %p2438_p9 = pneg %p2437_p5  ;;  %p2444_p7 = por %p2443_p8, %p2442_p12 }
  0x7e   : > { %p2445_p13 = pnand %p2444_p7, %p2438_p9 }
  0x80   : > { %2448 = shalt.err (!%p2445_p13)
}
  0x81   : > { %s3466_s1 = smov 8   ;;  %s3467_s5 = smov 128  }
  0x82   : > { %2106 = dma.hbm_to_vmem [thread:$0]  (!%p2871_p11), %s2861_s27, 2048, %s2865_s4, %s2887_s3, %s3467_s5, %s3467_s5, %s3466_s1  }
  0x83   : > { %s3468_s18 = sshll.u32 %s2601_s23, 7  ;;  %s236_s8 = scalar_lea.vmem [#allocation8], %s2877_s11 }
  0x84   : > { %s2923_s7 = scalar_lea.hbm %s3415_s2, %s3468_s18  ;;  %s243_s10 = sshll.u32 %s236_s8, 4  ;;  %s244_s10 = int_to_ptr.vmem [resolvable:$true] %s243_s10 }
  0x85   : > { %s2449_s24 = scalar_lea.hbm %s2923_s7, 128  ;;  %p3469_p4 = scmp.ne.s32.totalorder %s3447_s28, 0 }
  0x86   : > { %p2450_p0 = scmp.ne.s32.totalorder %s2923_s7, %s2449_s24  ;;  %s2454_s4 = scalar_lea.hbm %s3415_s2, 512 }
  0x87   : > { %p3470_p3 = pneg %p3469_p4  ;;  %p2455_p11 = scmp.lt.u32.totalorder %s2923_s7, %s3415_s2 }
  0x88   : > { %p2456_p10 = scmp.lt.u32.totalorder %s2454_s4, %s2449_s24  ;;  %p2458_p5 = scmp.lt.u32.totalorder %s2449_s24, %s2923_s7 }
  0x89   : > { %p2452_p2 = pnand %p2450_p0, %p3470_p3 }
  0x8a   : > { %p2457_p6 = por %p2456_p10, %p2455_p11 }
  0x8b   : > { %p2453_p1 = pneg %p2452_p2 }
  0x8c   : > { %p2459_p9 = por %p2458_p5, %p2457_p6 }
  0x8e   : > { %p2460_p12 = pnand %p2459_p9, %p2453_p1 }
  0x90   : > { %2463 = shalt.err (!%p2460_p12)
}
  0x91   : > { %s2464_s11 = scalar_lea.vmem %s244_s10, 128  ;;  %p3471_p7 = pmov %p3470_p3 }
  0x92   : > { %p2465_p8 = scmp.ne.s32.totalorder %s244_s10, %s2464_s11  ;;  %s2616_s18 = smov [#allocation8]  }
  0x93   : > { %s2469_s6 = sshll.u32 %s2616_s18, 4  ;;  %s2470_s6 = int_to_ptr.vmem [resolvable:$false] %s2469_s6 }
  0x94   : > { %p2467_p13 = pnand %p2465_p8, %p3471_p7  ;;  %s2471_s26 = scalar_lea.vmem %s2470_s6, 256 }
  0x95   : > { %p2472_p3 = scmp.lt.s32.totalorder %s244_s10, %s2470_s6  ;;  %p2473_p2 = scmp.lt.s32.totalorder %s2471_s26, %s2464_s11 }
  0x96   : > { %p2468_p0 = pneg %p2467_p13 }
  0x97   : > { %p2474_p10 = por %p2473_p2, %p2472_p3 }
  0x99   : > { %p2475_p11 = pnand %p2474_p10, %p2468_p0 }
  0x9b   : > { %2478 = shalt.err (!%p2475_p11)
}
  0x9c   : > { %2112 = dma.hbm_to_vmem [thread:$0]  (!%p3469_p4), %s2923_s7, 128, %s244_s10, %s2748_s30  }
  0x9d   : > { %p3472_p1 = scmp.ne.s32.totalorder %s3455_s9, 0 }
  0x9e   : > { %s2949_s8 = sand.u32 (!%p3472_p1), 1, %s2585_s19   ;;  %p3473_p6 = scmp.ne.s32.totalorder (!%p3472_p1), %s3450_s12, 0 }
  0x9f   : > { %252 = sbr.rel (%p3472_p1) target bundleno = 1664 (0x680), region = 36  ;;  %s1632_s24 = sshll.u32 (!%p3472_p1), %s2949_s8, 7 }
  0xa0   : > { %s255_s3 = scalar_lea.sflag (!%p3472_p1), [#allocation4], %s2949_s8  ;;  %s258_s27 = scalar_lea.vmem (!%p3472_p1), [#allocation3], %s1632_s24 }
  0xa6   : > { %2552 = dma.done.wait (%p3473_p6), %s255_s3, 2048  }
  0xa7   : > { %2554 = vsyncadd (%p3473_p6), %s255_s3, 4294965248  ;;  %s263_s28 = sand.u32 1, %s2780_s13   ;;  %s265_s30 = sand.u32 1, %s2573_s16  }
  0xa8   : > { %s1633_s9 = sshll.u32 %s265_s30, 5  ;;  %s264_s7 = scalar_lea.sflag [#allocation7], %s263_s28 }
  0xa9   : > { %s2961_s10 = scalar_lea.vmem [#allocation6], %s1633_s9  ;;  %p3474_p4 = scmp.ne.s32.totalorder %s3451_s14, 0 }
  0xab   : > { %2556 = dma.done.wait (%p3474_p4), %s264_s7, 640  }
  0xac   : > { %2558 = vsyncadd (%p3474_p4), %s264_s7, 4294966656  ;;  %s2967_s4 = sshll.u32 %s265_s30, 3  ;;  %p3475_p5 = scmp.eq.s32.totalorder %s2780_s13, 0 }
  0xad   : > { %s276_s12 = scalar_lea.vmem [#allocation8], %s2967_s4 }
  0xae   : > { %2560 = dma.done.wait (%p3475_p5), [#allocation10], 16   ;;  %p3476_p9 = pmov %p3475_p5 }
  0xaf   : > { %v315_v0 = vld [vmem:[%s258_s27] sm:$0xff]  ;;  %v316_v1 = vld [vmem:[%s258_s27 + $0x8] sm:$0xff]  ;;  %v317_v2 = vld [vmem:[%s258_s27 + $0x10] sm:$0xff]  ;;  %s2976_s13 = scalar_lea.vmem [#allocation11], %s1632_s24  ;;  %p1637_p12 = scmp.ne.s32.totalorder %s2593_s21, 0 }
  0xb0   : > { %2562 = vsyncadd (%p3476_p9), [#allocation10], 4294967280  ;;  %v318_v3 = vld [vmem:[%s258_s27 + $0x18] sm:$0xff]  ;;  %v319_v4 = vld [vmem:[%s258_s27 + $0x20] sm:$0xff]  ;;  %vm335_vm0 = vcmask (!%p1637_p12), 261120   ;;  %v2617_v16 = vmov (!%p1637_p12), 0.0  }
  0xb1   : > { %v320_v5 = vld [vmem:[%s258_s27 + $0x28] sm:$0xff]  ;;  %v321_v6 = vld [vmem:[%s258_s27 + $0x30] sm:$0xff]  ;;  %v322_v7 = vld [vmem:[%s258_s27 + $0x38] sm:$0xff]  ;;  %334 = sbr.rel (%p1637_p12) target bundleno = 187 (0xbb), region = 56  ;;  %336 = vst.msk [vmem:[#allocation2] sm:$0xff] (!%p1637_p12), %vm335_vm0, %v2617_v16 }
  0xb2   : > { %v323_v8 = vld [vmem:[%s258_s27 + $0x40] sm:$0xff]  ;;  %v324_v9 = vld [vmem:[%s258_s27 + $0x48] sm:$0xff]  ;;  %v325_v10 = vld [vmem:[%s258_s27 + $0x50] sm:$0xff]  ;;  %337 = vst.msk [vmem:[#allocation2 + $0x8] sm:$0xff] (!%p1637_p12), %vm335_vm0, %v2617_v16 }
  0xb3   : > { %v326_v11 = vld [vmem:[%s258_s27 + $0x58] sm:$0xff]  ;;  %v327_v12 = vld [vmem:[%s258_s27 + $0x60] sm:$0xff]  ;;  %v328_v13 = vld [vmem:[%s258_s27 + $0x68] sm:$0xff]  ;;  %338 = vst.msk [vmem:[#allocation2 + $0x10] sm:$0xff] (!%p1637_p12), %vm335_vm0, %v2617_v16 }
  0xb4   : > { %v329_v14 = vld [vmem:[%s258_s27 + $0x70] sm:$0xff]  ;;  %v330_v15 = vld [vmem:[%s258_s27 + $0x78] sm:$0xff]  ;;  %339 = vst.msk [vmem:[#allocation2 + $0x18] sm:$0xff] (!%p1637_p12), %vm335_vm0, %v2617_v16  ;;  %340 = vst.msk [vmem:[#allocation2 + $0x20] sm:$0xff] (!%p1637_p12), %vm335_vm0, %v2617_v16 }
  0xb5   : > { %341 = vst.msk [vmem:[#allocation2 + $0x28] sm:$0xff] (!%p1637_p12), %vm335_vm0, %v2617_v16  ;;  %342 = vst.msk [vmem:[#allocation2 + $0x30] sm:$0xff] (!%p1637_p12), %vm335_vm0, %v2617_v16 }
  0xb6   : > { %343 = vst.msk [vmem:[#allocation2 + $0x38] sm:$0xff] (!%p1637_p12), %vm335_vm0, %v2617_v16  ;;  %344 = vst.msk [vmem:[#allocation2 + $0x40] sm:$0xff] (!%p1637_p12), %vm335_vm0, %v2617_v16 }
  0xb7   : > { %345 = vst.msk [vmem:[#allocation2 + $0x48] sm:$0xff] (!%p1637_p12), %vm335_vm0, %v2617_v16  ;;  %346 = vst.msk [vmem:[#allocation2 + $0x50] sm:$0xff] (!%p1637_p12), %vm335_vm0, %v2617_v16 }
  0xb8   : > { %347 = vst.msk [vmem:[#allocation2 + $0x58] sm:$0xff] %vm335_vm0, %v2617_v16  ;;  %348 = vst.msk [vmem:[#allocation2 + $0x60] sm:$0xff] %vm335_vm0, %v2617_v16 }
  0xb9   : > { %349 = vst.msk [vmem:[#allocation2 + $0x68] sm:$0xff] %vm335_vm0, %v2617_v16  ;;  %350 = vst.msk [vmem:[#allocation2 + $0x70] sm:$0xff] %vm335_vm0, %v2617_v16 }
  0xba   : > { %351 = vst.msk [vmem:[#allocation2 + $0x78] sm:$0xff] %vm335_vm0, %v2617_v16 }
  0xbb PF: > { %v352_v17 = vld [vmem:[%s2961_s10] sm:$0xff]  ;;  %v353_v18 = vld [vmem:[%s2961_s10 + $0x8] sm:$0xff]  ;;  %v354_v19 = vld [vmem:[%s2961_s10 + $0x10] sm:$0xff]  ;;  %vm356_vm1 = vcmask 261120   ;;  %vm598_vm2 = vcmask 64512   ;;  %s2618_s14 = smov 120  }
  0xbc   : > { %v1983_v20 = vpack.c.bf16 %v353_v18, %v352_v17  ;;  %v355_v21 = vld [vmem:[%s2961_s10 + $0x18] sm:$0xff]  ;;  %1821 = vmatprep.mubr.msk.f32.mxu0 %vm356_vm1, %v315_v0  ;;  %s2619_s1 = smov 112   ;;  %vm3085_vm3 = vmpackc.low %vm598_vm2, %vm598_vm2  ;;  %p1702_p8 = scmp.ne.s32.totalorder %s2593_s21, 3 }
  0xbd   : > { %v1987_v22 = vpack.c.bf16 %v355_v21, %v354_v19 }
  0xbe   : > { %1984 = vmatprep.subr.bf16.mxu0 %v1983_v20 }
  0xbf   : > { %1986 = vmatpush3.bf16.msra.mxu0 %v1983_v20 }
  0xc0   : > { %1988 = vmatprep.subr.bf16.mxu0 %v1987_v22 }
  0xc3   : > { %1990 = vmatpush3.bf16.msra.mxu0 %v1987_v22 }
  0xc6   : > { %1822 = vmatmul.mubr.msk.f32.vlgmr.msra.gmra.mrb[0].mxu0 %vm356_vm1, %v316_v1 }
  0xc7   : > { %1824 = vmatprep.mubr.msk.f32.mxu0 %vm356_vm1, %v317_v2 }
  0xca   : > { %1825 = vmatmul.mubr.msk.f32.gmra.mrb[2].mxu0 %vm356_vm1, %v318_v3 }
  0xcb   : > { %1827 = vmatprep.mubr.msk.f32.mxu0 %vm356_vm1, %v319_v4 }
  0xce   : > { %1828 = vmatmul.mubr.msk.f32.gmra.mrb[4].mxu0 %vm356_vm1, %v320_v5 }
  0xcf   : > { %1830 = vmatprep.mubr.msk.f32.mxu0 %vm356_vm1, %v321_v6 }
  0xd2   : > { %1831 = vmatmul.mubr.msk.f32.gmra.mrb[6].mxu0 %vm356_vm1, %v322_v7 }
  0xd3   : > { %1833 = vmatprep.mubr.msk.f32.mxu0 %vm356_vm1, %v323_v8 }
  0xd6   : > { %1834 = vmatmul.mubr.msk.f32.gmra.mrb[8].mxu0 %vm356_vm1, %v324_v9 }
  0xd7   : > { %1836 = vmatprep.mubr.msk.f32.mxu0 %vm356_vm1, %v325_v10 }
  0xda   : > { %1837 = vmatmul.mubr.msk.f32.gmra.mrb[10].mxu0 %vm356_vm1, %v326_v11 }
  0xdb   : > { %1839 = vmatprep.mubr.msk.f32.mxu0 %vm356_vm1, %v327_v12 }
  0xde   : > { %1840 = vmatmul.mubr.msk.f32.gmra.mrb[12].mxu0 %vm356_vm1, %v328_v13 }
  0xdf   : > { %1842 = vmatprep.mubr.msk.f32.mxu0 %vm356_vm1, %v329_v14 }
  0xe2   : > { %1843 = vmatmul.mubr.msk.f32.gmra.mrb[14].mxu0 %vm356_vm1, %v330_v15 }
 0x199   : > { %v3015_v23 = vpop.f32.mrb[0].mxu0 }
 0x19a   : > { %v471_v24 = vpop.f32.mrb[1].mxu0 }
 0x19b   : > { %v2257_v25 = vpack.i.bf16 %v3015_v23, %v471_v24  ;;  %1877 = vmatprep.mubr.msk.f32.mxu1 %vm598_vm2, %v471_v24 }
 0x19d   : > { %2218 = vrot.lane.b32.xlu0 %v2257_v25, %s2618_s14  ;;  %v3020_v26 = vpop.f32.mrb[2].mxu0 }
 0x19e   : > { %v3022_v27 = vpop.f32.mrb[3].mxu0 }
 0x19f   : > { %v2262_v28 = vpack.i.bf16 %v3020_v26, %v3022_v27 }
 0x1a1   : > { %2223 = vrot.lane.b32.xlu0 %v2262_v28, %s2618_s14  ;;  %v3027_v29 = vpop.f32.mrb[4].mxu0 }
 0x1a2   : > { %v3029_v30 = vpop.f32.mrb[5].mxu0 }
 0x1a3   : > { %v2267_v31 = vpack.i.bf16 %v3027_v29, %v3029_v30 }
 0x1a5   : > { %v3033_v32 = vpop.f32.mrb[6].mxu0  ;;  %2228 = vrot.lane.b32.xlu1 %v2267_v31, %s2618_s14 }
 0x1a6   : > { %v3036_v33 = vpop.f32.mrb[7].mxu0 }
 0x1a7   : > { %v2272_v34 = vpack.i.bf16 %v3033_v32, %v3036_v33 }
 0x1a9   : > { %v3040_v35 = vpop.f32.mrb[8].mxu0  ;;  %2233 = vrot.lane.b32.xlu1 %v2272_v34, %s2618_s14 }
 0x1aa   : > { %v3043_v36 = vpop.f32.mrb[9].mxu0 }
 0x1ab   : > { %v2277_v37 = vpack.i.bf16 %v3040_v35, %v3043_v36 }
 0x1ad   : > { %v3047_v38 = vpop.f32.mrb[10].mxu0  ;;  %2238 = vrot.lane.b32.xlu0 %v2277_v37, %s2618_s14 }
 0x1ae   : > { %v3050_v39 = vpop.f32.mrb[11].mxu0 }
 0x1af   : > { %v3054_v40 = vpack.i.bf16 %v3047_v38, %v3050_v39 }
 0x1b1   : > { %v3056_v41 = vpop.f32.mrb[12].mxu0  ;;  %2243 = vrot.lane.b32.xlu1 %v3054_v40, %s2618_s14 }
 0x1b2   : > { %v3060_v42 = vpop.f32.mrb[13].mxu0 }
 0x1b3   : > { %v3064_v43 = vpack.i.bf16 %v3056_v41, %v3060_v42 }
 0x1b5   : > { %2248 = vrot.lane.b32.xlu0 %v3064_v43, %s2618_s14  ;;  %v3068_v44 = vpop.f32.mrb[14].mxu0 }
 0x1b6   : > { %v3070_v45 = vpop.f32.mrb[15].mxu0 }
 0x1b7   : > { %v3074_v46 = vpack.i.bf16 %v3068_v44, %v3070_v45 }
 0x1b9   : > { %2263 = vrot.lane.b32.xlu0 %v2262_v28, %s2619_s1  ;;  %2253 = vrot.lane.b32.xlu1 %v3074_v46, %s2618_s14 }
 0x1bd   : > { %2273 = vrot.lane.b32.xlu0 %v2272_v34, %s2619_s1  ;;  %2258 = vrot.lane.b32.xlu1 %v2257_v25, %s2619_s1 }
 0x1c1   : > { %2268 = vrot.lane.b32.xlu1 %v2267_v31, %s2619_s1 }
 0x1c5   : > { %2278 = vrot.lane.b32.xlu1 %v2277_v37, %s2619_s1 }
 0x20f   : > { %v2219_v47 = vpop.permute.xlu0 %2218 }
 0x210   : > { %v2221_v48 = vunpack.i.h.bf16 %v2219_v47  ;;  %v2220_v49 = vunpack.i.l.bf16 %v2219_v47 }
 0x212   : > { %v1991_v51 = vpack.c.bf16 %v2221_v48, %v2220_v49 }
 0x213   : > { %v2224_v52 = vpop.permute.xlu0 %2223 }
 0x214   : > { %1993 = vmatprep.subr.msk.bf16.mxu1 %vm3085_vm3, %v1991_v51  ;;  %v2226_v53 = vunpack.i.h.bf16 %v2224_v52  ;;  %v2225_v54 = vunpack.i.l.bf16 %v2224_v52 }
 0x215   : > { %1996 = vmatpush3.bf16.xpose.msk.msra.mxu1 %vm3085_vm3, %v1991_v51 }
 0x216   : > { %v1997_v55 = vpack.c.bf16 %v2226_v53, %v2225_v54 }
 0x217   : > { %v2229_v56 = vpop.permute.xlu1 %2228 }
 0x218   : > { %1999 = vmatprep.subr.msk.bf16.mxu1 %vm3085_vm3, %v1997_v55  ;;  %v2231_v57 = vunpack.i.h.bf16 %v2229_v56  ;;  %v2230_v58 = vunpack.i.l.bf16 %v2229_v56 }
 0x21a   : > { %v2003_v59 = vpack.c.bf16 %v2231_v57, %v2230_v58 }
 0x21b   : > { %v2234_v60 = vpop.permute.xlu1 %2233 }
 0x21c   : > { %v2236_v61 = vunpack.i.h.bf16 %v2234_v60  ;;  %v2235_v62 = vunpack.i.l.bf16 %v2234_v60 }
 0x21d   : > { %2002 = vmatpush3.bf16.xpose.msk.msra.mxu1 %vm3085_vm3, %v1997_v55 }
 0x21e   : > { %2005 = vmatprep.subr.msk.bf16.mxu1 %vm3085_vm3, %v2003_v59  ;;  %v2009_v0 = vpack.c.bf16 %v2236_v61, %v2235_v62 }
 0x21f   : > { %v2239_v63 = vpop.permute.xlu0 %2238 }
 0x220   : > { %v2241_v2 = vunpack.i.h.bf16 %v2239_v63  ;;  %v2240_v3 = vunpack.i.l.bf16 %v2239_v63 }
 0x222   : > { %v2015_v5 = vpack.c.bf16 %v2241_v2, %v2240_v3 }
 0x223   : > { %v2244_v1 = vpop.permute.xlu1 %2243 }
 0x224   : > { %v2246_v8 = vunpack.i.h.bf16 %v2244_v1  ;;  %v2245_v9 = vunpack.i.l.bf16 %v2244_v1 }
 0x225   : > { %2008 = vmatpush3.bf16.xpose.msk.msra.mxu1 %vm3085_vm3, %v2003_v59 }
 0x226   : > { %2011 = vmatprep.subr.msk.bf16.mxu1 %vm3085_vm3, %v2009_v0  ;;  %v2021_v15 = vpack.c.bf16 %v2246_v8, %v2245_v9 }
 0x227   : > { %v2249_v4 = vpop.permute.xlu0 %2248 }
 0x228   : > { %v2251_v22 = vunpack.i.h.bf16 %v2249_v4  ;;  %v2250_v24 = vunpack.i.l.bf16 %v2249_v4 }
 0x22a   : > { %v2027_v37 = vpack.c.bf16 %v2251_v22, %v2250_v24 }
 0x22b   : > { %v2254_v6 = vpop.permute.xlu1 %2253  ;;  %v2264_v7 = vpop.permute.xlu0 %2263 }
 0x22c   : > { %v2266_v11 = vunpack.i.h.bf16 %v2264_v7  ;;  %v2265_v12 = vunpack.i.l.bf16 %v2264_v7  ;;  %v2256_v51 = vunpack.i.h.bf16 %v2254_v6  ;;  %v2255_v52 = vunpack.i.l.bf16 %v2254_v6 }
 0x22d   : > { %2014 = vmatpush3.bf16.xpose.msk.msra.mxu1 %vm3085_vm3, %v2009_v0 }
 0x22e   : > { %2017 = vmatprep.subr.msk.bf16.mxu1 %vm3085_vm3, %v2015_v5  ;;  %v2043_v18 = vpack.c.bf16 %v2266_v11, %v2265_v12  ;;  %v2033_v54 = vpack.c.bf16 %v2256_v51, %v2255_v52 }
 0x22f   : > { %v2259_v10 = vpop.permute.xlu1 %2258  ;;  %v2274_v21 = vpop.permute.xlu0 %2273 }
 0x230   : > { %v2261_v13 = vunpack.i.h.bf16 %v2259_v10  ;;  %v2260_v14 = vunpack.i.l.bf16 %v2259_v10  ;;  %v2276_v25 = vunpack.i.h.bf16 %v2274_v21  ;;  %v2275_v28 = vunpack.i.l.bf16 %v2274_v21 }
 0x232   : > { %v2039_v16 = vpack.c.bf16 %v2261_v13, %v2260_v14  ;;  %v2051_v47 = vpack.c.bf16 %v2276_v25, %v2275_v28 }
 0x233   : > { %v2269_v17 = vpop.permute.xlu1 %2268 }
 0x234   : > { %v2271_v19 = vunpack.i.h.bf16 %v2269_v17  ;;  %v2270_v20 = vunpack.i.l.bf16 %v2269_v17  ;;  %2040 = vmatprep.subr.bf16.mxu0 %v2039_v16 }
 0x235   : > { %2020 = vmatpush3.bf16.xpose.msk.msra.mxu1 %vm3085_vm3, %v2015_v5  ;;  %2042 = vmatpush3.bf16.msra.mxu0 %v2039_v16 }
 0x236   : > { %2044 = vmatprep.subr.bf16.mxu0 %v2043_v18  ;;  %2023 = vmatprep.subr.msk.bf16.mxu1 %vm3085_vm3, %v2021_v15  ;;  %v2047_v31 = vpack.c.bf16 %v2271_v19, %v2270_v20 }
 0x237   : > { %v2279_v34 = vpop.permute.xlu1 %2278 }
 0x238   : > { %v2281_v48 = vunpack.i.h.bf16 %v2279_v34  ;;  %v2280_v49 = vunpack.i.l.bf16 %v2279_v34 }
 0x239   : > { %2046 = vmatpush3.bf16.msra.mxu0 %v2043_v18 }
 0x23a   : > { %2048 = vmatprep.subr.bf16.mxu0 %v2047_v31  ;;  %v2055_v53 = vpack.c.bf16 %v2281_v48, %v2280_v49 }
 0x23d   : > { %2026 = vmatpush3.bf16.xpose.msk.msra.mxu1 %vm3085_vm3, %v2021_v15  ;;  %2050 = vmatpush3.bf16.msra.mxu0 %v2047_v31 }
 0x23e   : > { %2052 = vmatprep.subr.bf16.mxu0 %v2051_v47  ;;  %2029 = vmatprep.subr.msk.bf16.mxu1 %vm3085_vm3, %v2027_v37 }
 0x241   : > { %2054 = vmatpush3.bf16.msra.mxu0 %v2051_v47 }
 0x242   : > { %2056 = vmatprep.subr.bf16.mxu0 %v2055_v53 }
 0x245   : > { %2032 = vmatpush3.bf16.xpose.msk.msra.mxu1 %vm3085_vm3, %v2027_v37  ;;  %2058 = vmatpush3.bf16.msra.mxu0 %v2055_v53 }
 0x246   : > { %2035 = vmatprep.subr.msk.bf16.mxu1 %vm3085_vm3, %v2033_v54 }
 0x24d   : > { %2038 = vmatpush3.bf16.xpose.msk.msra.mxu1 %vm3085_vm3, %v2033_v54 }
 0x24e   : > { %2071 = vmatprep.subr.bf16.mxu1 %v2039_v16 }
 0x254   : > { %1878 = vmatmul.mubr.msk.f32.vlgmr.msra.gmra.mrb[0].mxu1 %vm598_vm2, %v3015_v23  ;;  %v808_v23 = vlaneseq }
 0x255   : > { %1880 = vmatprep.mubr.msk.f32.mxu1 %vm598_vm2, %v3022_v27  ;;  %2079 = vmatpush3.bf16.msra.mxu1 %v2039_v16 }
 0x256   : > { %2072 = vmatprep.subr.bf16.mxu1 %v2043_v18 }
 0x258   : > { %1881 = vmatmul.mubr.msk.f32.gmra.mrb[2].mxu1 %vm598_vm2, %v3020_v26  ;;  %v809_v26 = vand.u32 127, %v808_v23 }
 0x259   : > { %1883 = vmatprep.mubr.msk.f32.mxu1 %vm598_vm2, %v3029_v30  ;;  %2080 = vmatpush3.bf16.msra.mxu1 %v2043_v18 }
 0x25a   : > { %2073 = vmatprep.subr.bf16.mxu1 %v2047_v31  ;;  %vm810_vm4 = vcmp.lt.s32.totalorder %v809_v26, 8 }
 0x25c   : > { %1884 = vmatmul.mubr.msk.f32.gmra.mrb[4].mxu1 %vm598_vm2, %v3027_v29 }
 0x25d   : > { %1886 = vmatprep.mubr.msk.f32.mxu1 %vm598_vm2, %v3036_v33  ;;  %2081 = vmatpush3.bf16.msra.mxu1 %v2047_v31 }
 0x25e   : > { %2074 = vmatprep.subr.bf16.mxu1 %v2051_v47 }
 0x260   : > { %1887 = vmatmul.mubr.msk.f32.gmra.mrb[6].mxu1 %vm598_vm2, %v3033_v32 }
 0x261   : > { %1889 = vmatprep.mubr.msk.f32.mxu1 %vm598_vm2, %v3043_v36  ;;  %2082 = vmatpush3.bf16.msra.mxu1 %v2051_v47 }
 0x262   : > { %2075 = vmatprep.subr.bf16.mxu1 %v2055_v53 }
 0x264   : > { %1890 = vmatmul.mubr.msk.f32.gmra.mrb[8].mxu1 %vm598_vm2, %v3040_v35 }
 0x265   : > { %1892 = vmatprep.mubr.msk.f32.mxu1 %vm598_vm2, %v3050_v39  ;;  %2083 = vmatpush3.bf16.msra.mxu1 %v2055_v53 }
 0x268   : > { %1893 = vmatmul.mubr.msk.f32.gmra.mrb[10].mxu1 %vm598_vm2, %v3047_v38 }
 0x269   : > { %1895 = vmatprep.mubr.msk.f32.mxu1 %vm598_vm2, %v3060_v42 }
 0x26c   : > { %1896 = vmatmul.mubr.msk.f32.gmra.mrb[12].mxu1 %vm598_vm2, %v3056_v41 }
 0x26d   : > { %1898 = vmatprep.mubr.msk.f32.mxu1 %vm598_vm2, %v3070_v45 }
 0x270   : > { %1899 = vmatmul.mubr.msk.f32.gmra.mrb[14].mxu1 %vm598_vm2, %v3068_v44 }
 0x327   : > { %v1879_v27 = vpop.f32.mrb[0].mxu1 }
 0x328   : > { %v729_v29 = vpop.f32.mrb[1].mxu1  ;;  %v814_v30 = vsel %vm810_vm4, %v1879_v27, -1e+30 }
 0x329   : > { %831 = vmax.xlane.f32.xlu1 %v814_v30  ;;  %v813_v32 = vsel %vm810_vm4, %v729_v29, -1e+30 }
 0x32a   : > { %829 = vmax.xlane.f32.xlu0 %v813_v32 }
 0x32b   : > { %v1882_v33 = vpop.f32.mrb[2].mxu1 }
 0x32c   : > { %v739_v35 = vpop.f32.mrb[3].mxu1  ;;  %v816_v36 = vsel %vm810_vm4, %v1882_v33, -1e+30 }
 0x32d   : > { %v815_v41 = vsel %vm810_vm4, %v739_v35, -1e+30 }
 0x32e   : > { %835 = vmax.xlane.f32.xlu0 %v816_v36 }
 0x32f   : > { %v1885_v38 = vpop.f32.mrb[4].mxu1 }
 0x330   : > { %v749_v39 = vpop.f32.mrb[5].mxu1  ;;  %v818_v50 = vsel %vm810_vm4, %v1885_v38, -1e+30 }
 0x331   : > { %v817_v42 = vsel %vm810_vm4, %v749_v39, -1e+30 }
 0x332   : > { %833 = vmax.xlane.f32.xlu0 %v815_v41  ;;  %837 = vmax.xlane.f32.xlu1 %v817_v42 }
 0x333   : > { %v1888_v44 = vpop.f32.mrb[6].mxu1 }
 0x334   : > { %v759_v45 = vpop.f32.mrb[7].mxu1  ;;  %v820_v58 = vsel %vm810_vm4, %v1888_v44, -1e+30 }
 0x335   : > { %v3158_v55 = vsel %vm810_vm4, %v759_v45, -1e+30 }
 0x336   : > { %839 = vmax.xlane.f32.xlu0 %v818_v50  ;;  %841 = vmax.xlane.f32.xlu1 %v3158_v55 }
 0x337   : > { %v1891_v56 = vpop.f32.mrb[8].mxu1 }
 0x338   : > { %v769_v57 = vpop.f32.mrb[9].mxu1  ;;  %v3167_v62 = vsel %vm810_vm4, %v1891_v56, -1e+30 }
 0x339   : > { %v3163_v59 = vsel %vm810_vm4, %v769_v57, -1e+30 }
 0x33a   : > { %843 = vmax.xlane.f32.xlu0 %v820_v58  ;;  %845 = vmax.xlane.f32.xlu1 %v3163_v59 }
 0x33b   : > { %v1894_v60 = vpop.f32.mrb[10].mxu1 }
 0x33c   : > { %v779_v61 = vpop.f32.mrb[11].mxu1  ;;  %v3175_v2 = vsel %vm810_vm4, %v1894_v60, -1e+30 }
 0x33d   : > { %v3170_v63 = vsel %vm810_vm4, %v779_v61, -1e+30 }
 0x33e   : > { %847 = vmax.xlane.f32.xlu0 %v3167_v62  ;;  %849 = vmax.xlane.f32.xlu1 %v3170_v63 }
 0x33f   : > { %v1897_v0 = vpop.f32.mrb[12].mxu1 }
 0x340   : > { %v789_v1 = vpop.f32.mrb[13].mxu1  ;;  %v3183_v6 = vsel %vm810_vm4, %v1897_v0, -1e+30 }
 0x341   : > { %v3178_v3 = vsel %vm810_vm4, %v789_v1, -1e+30 }
 0x342   : > { %851 = vmax.xlane.f32.xlu0 %v3175_v2  ;;  %853 = vmax.xlane.f32.xlu1 %v3178_v3 }
 0x343   : > { %v1900_v4 = vpop.f32.mrb[14].mxu1 }
 0x344   : > { %v799_v5 = vpop.f32.mrb[15].mxu1  ;;  %v3191_v8 = vsel %vm810_vm4, %v1900_v4, -1e+30 }
 0x345   : > { %v3186_v7 = vsel %vm810_vm4, %v799_v5, -1e+30 }
 0x346   : > { %855 = vmax.xlane.f32.xlu0 %v3183_v6  ;;  %857 = vmax.xlane.f32.xlu1 %v3186_v7 }
 0x34a   : > { %859 = vmax.xlane.f32.xlu0 %v3191_v8 }
 0x357   : > { %2283 = vrot.lane.b32.xlu1 %v3054_v40, %s2619_s1 }
 0x360   : > { %2288 = vrot.lane.b32.xlu0 %v3064_v43, %s2619_s1 }
 0x3b6   : > { %v832_v9 = vpop.xlane.xlu1 %831 }
 0x3b7   : > { %v862_v10 = vsub.f32 %v814_v30, %v832_v9  ;;  %v830_v11 = vpop.xlane.xlu0 %829 }
 0x3b8   : > { %v861_v12 = vsub.f32 %v813_v32, %v830_v11 }
 0x3b9   : > { %v879_v13 = vmul.f32 1.442695, %v862_v10 }
 0x3ba   : > { %v877_v14 = vmul.f32 1.442695, %v861_v12 }
 0x3bb   : > { %2297 = vpow2.f32 %v879_v13  ;;  %v836_v15 = vpop.xlane.xlu0 %835 }
 0x3bc   : > { %2299 = vpow2.f32 %v877_v14  ;;  %v864_v16 = vsub.f32 %v816_v36, %v836_v15 }
 0x3be   : > { %v883_v17 = vmul.f32 1.442695, %v864_v16 }
 0x3bf   : > { %v834_v18 = vpop.xlane.xlu0 %833  ;;  %v838_v19 = vpop.xlane.xlu1 %837 }
 0x3c0   : > { %2301 = vpow2.f32 %v883_v17  ;;  %v863_v20 = vsub.f32 %v815_v41, %v834_v18  ;;  %v865_v21 = vsub.f32 %v817_v42, %v838_v19 }
 0x3c2   : > { %v881_v40 = vmul.f32 1.442695, %v863_v20  ;;  %v885_v22 = vmul.f32 1.442695, %v865_v21 }
 0x3c3   : > { %v840_v24 = vpop.xlane.xlu0 %839  ;;  %v842_v43 = vpop.xlane.xlu1 %841 }
 0x3c4   : > { %2303 = vpow2.f32 %v881_v40  ;;  %v866_v25 = vsub.f32 %v818_v50, %v840_v24  ;;  %v867_v48 = vsub.f32 %v3158_v55, %v842_v43 }
 0x3c5   : > { %v3198_v28 = vpop.eup %2297  ;;  %2305 = vpow2.f32 %v885_v22 }
 0x3c6   : > { %v3200_v31 = vpop.eup %2299  ;;  %v887_v34 = vmul.f32 1.442695, %v866_v25  ;;  %911 = vadd.xlane.f32.xlu0 %v3198_v28  ;;  %v889_v23 = vmul.f32 1.442695, %v867_v48 }
 0x3c7   : > { %v844_v37 = vpop.xlane.xlu0 %843  ;;  %v846_v47 = vpop.xlane.xlu1 %845  ;;  %909 = vadd.xlane.f32.xlu1 %v3200_v31 }
 0x3c8   : > { %2307 = vpow2.f32 %v887_v34  ;;  %v868_v49 = vsub.f32 %v820_v58, %v844_v37  ;;  %v869_v26 = vsub.f32 %v3163_v59, %v846_v47 }
 0x3ca   : > { %v3205_v51 = vpop.eup %2301  ;;  %v891_v52 = vmul.f32 1.442695, %v868_v49  ;;  %v893_v33 = vmul.f32 1.442695, %v869_v26 }
 0x3cb   : > { %v3207_v53 = vpop.xlane.xlu0 %847  ;;  %v850_v54 = vpop.xlane.xlu1 %849  ;;  %915 = vadd.xlane.f32.xlu0 %v3205_v51 }
 0x3cc   : > { %2309 = vpow2.f32 %v891_v52  ;;  %v871_v35 = vsub.f32 %v3170_v63, %v850_v54 }
 0x3cd   : > { %2311 = vpow2.f32 %v889_v23 }
 0x3ce   : > { %v3211_v27 = vpop.eup %2303  ;;  %2313 = vpow2.f32 %v893_v33  ;;  %v897_v42 = vmul.f32 1.442695, %v871_v35 }
 0x3cf   : > { %v3213_v29 = vpop.eup %2305  ;;  %v852_v30 = vpop.xlane.xlu0 %851  ;;  %913 = vadd.xlane.f32.xlu0 %v3211_v27 }
 0x3d0   : > { %v854_v32 = vpop.xlane.xlu1 %853  ;;  %917 = vadd.xlane.f32.xlu1 %v3213_v29  ;;  %2315 = vpow2.f32 %v897_v42  ;;  %v872_v13 = vsub.f32 %v3175_v2, %v852_v30 }
 0x3d1   : > { %v873_v38 = vsub.f32 %v3178_v3, %v854_v32 }
 0x3d2   : > { %v3218_v36 = vpop.eup %2307  ;;  %v899_v14 = vmul.f32 1.442695, %v872_v13 }
 0x3d3   : > { %v856_v39 = vpop.xlane.xlu0 %855  ;;  %919 = vadd.xlane.f32.xlu0 %v3218_v36  ;;  %v901_v45 = vmul.f32 1.442695, %v873_v38 }
 0x3d4   : > { %v858_v41 = vpop.xlane.xlu1 %857  ;;  %v874_v15 = vsub.f32 %v3183_v6, %v856_v39 }
 0x3d5   : > { %v875_v56 = vsub.f32 %v3186_v7, %v858_v41  ;;  %2317 = vpow2.f32 %v901_v45 }
 0x3d6   : > { %v3222_v44 = vpop.eup %2309  ;;  %v903_v16 = vmul.f32 1.442695, %v874_v15 }
 0x3d7   : > { %923 = vadd.xlane.f32.xlu0 %v3222_v44  ;;  %v860_v50 = vpop.xlane.xlu0 %859  ;;  %v3226_v59 = vpop.eup %2311  ;;  %v905_v63 = vmul.f32 1.442695, %v875_v56 }
 0x3d8   : > { %v2284_v55 = vpop.permute.xlu1 %2283  ;;  %v876_v0 = vsub.f32 %v3191_v8, %v860_v50  ;;  %v3230_v4 = vpop.eup %2313 }
 0x3d9   : > { %v2286_v57 = vunpack.i.h.bf16 %v2284_v55  ;;  %v2285_v58 = vunpack.i.l.bf16 %v2284_v55  ;;  %2319 = vpow2.f32 %v905_v63 }
 0x3da   : > { %v907_v7 = vmul.f32 1.442695, %v876_v0  ;;  %v3235_v8 = vpop.eup %2315 }
 0x3db   : > { %v2059_v60 = vpack.c.bf16 %v2286_v57, %v2285_v58  ;;  %921 = vadd.xlane.f32.xlu0 %v3226_v59  ;;  %v2289_v61 = vpop.permute.xlu0 %2288 }
 0x3dc   : > { %v2291_v1 = vunpack.i.h.bf16 %v2289_v61  ;;  %v2290_v3 = vunpack.i.l.bf16 %v2289_v61  ;;  %2321 = vpow2.f32 %v907_v7 }
 0x3dd   : > { %2060 = vmatprep.subr.bf16.mxu0 %v2059_v60  ;;  %2076 = vmatprep.subr.bf16.mxu1 %v2059_v60 }
 0x3de   : > { %2062 = vmatpush3.bf16.msra.mxu0 %v2059_v60  ;;  %2084 = vmatpush3.bf16.msra.mxu1 %v2059_v60  ;;  %v2063_v5 = vpack.c.bf16 %v2291_v1, %v2290_v3 }
 0x3df   : > { %925 = vadd.xlane.f32.xlu0 %v3230_v4  ;;  %v3238_v9 = vpop.eup %2317 }
 0x3e0   : > { %2064 = vmatprep.subr.bf16.mxu0 %v2063_v5  ;;  %2077 = vmatprep.subr.bf16.mxu1 %v2063_v5 }
 0x3e1   : > { %2293 = vrot.lane.b32.xlu1 %v3074_v46, %s2619_s1  ;;  %v870_v46 = vsub.f32 %v3167_v62, %v3207_v53 }
 0x3e2   : > { %2066 = vmatpush3.bf16.msra.mxu0 %v2063_v5  ;;  %2085 = vmatpush3.bf16.msra.mxu1 %v2063_v5 }
 0x3e3   : > { %929 = vadd.xlane.f32.xlu0 %v3235_v8  ;;  %v3241_v10 = vpop.eup %2319  ;;  %v895_v12 = vmul.f32 1.442695, %v870_v46 }
 0x3e5   : > { %2323 = vpow2.f32 %v895_v12 }
 0x3e6   : > { %v3244_v11 = vpop.eup %2321  ;;  %2325 = vpow2.f32 %v899_v14 }
 0x3e7   : > { %933 = vadd.xlane.f32.xlu0 %v3238_v9  ;;  %2327 = vpow2.f32 %v903_v16 }
 0x3eb   : > { %937 = vadd.xlane.f32.xlu0 %v3241_v10 }
 0x3ef   : > { %939 = vadd.xlane.f32.xlu0 %v3244_v11  ;;  %v3251_v17 = vpop.eup %2323 }
 0x3f0   : > { %v3254_v18 = vpop.eup %2325 }
 0x3f1   : > { %v3257_v19 = vpop.eup %2327 }
 0x405   : > { %927 = vadd.xlane.f32.xlu1 %v3251_v17 }
 0x409   : > { %931 = vadd.xlane.f32.xlu1 %v3254_v18 }
 0x40d   : > { %935 = vadd.xlane.f32.xlu1 %v3257_v19 }
 0x453   : > { %v912_v62 = vpop.xlane.xlu0 %911 }
 0x454   : > { %v910_v2 = vpop.xlane.xlu1 %909 }
 0x455   : > { %2329 = vrcp.f32 %v910_v2 }
 0x456   : > { %2331 = vrcp.f32 %v912_v62 }
 0x458   : > { %v916_v20 = vpop.xlane.xlu0 %915 }
 0x45c   : > { %v914_v6 = vpop.xlane.xlu0 %913 }
 0x45d   : > { %2333 = vrcp.f32 %v914_v6  ;;  %v918_v21 = vpop.xlane.xlu1 %917 }
 0x45e   : > { %2335 = vrcp.f32 %v916_v20 }
 0x45f   : > { %v2330_v40 = vpop.eup %2329  ;;  %2337 = vrcp.f32 %v918_v21 }
 0x460   : > { %v920_v22 = vpop.xlane.xlu0 %919  ;;  %v957_v24 = vmul.f32 %v2330_v40, %v3200_v31  ;;  %v2332_v48 = vpop.eup %2331  ;;  %v1167_v40 = vld [vmem:[#allocation2 + $0x8] sm:$0xff] }
 0x461   : > { %v2294_v43 = vpop.permute.xlu1 %2293  ;;  %2339 = vrcp.f32 %v920_v22  ;;  %v958_v52 = vmul.f32 %v2332_v48, %v3198_v28  ;;  %v1166_v22 = vld [vmem:[#allocation2] sm:$0xff] }
 0x462   : > { %v2296_v25 = vunpack.i.h.bf16 %v2294_v43  ;;  %v2295_v34 = vunpack.i.l.bf16 %v2294_v43  ;;  %1933 = vmatprep.mubr.f32.mxu0 %v957_v24 }
 0x464   : > { %v2067_v37 = vpack.c.bf16 %v2296_v25, %v2295_v34  ;;  %v924_v47 = vpop.xlane.xlu0 %923 }
 0x465   : > { %2341 = vrcp.f32 %v924_v47  ;;  %v1168_v47 = vld [vmem:[#allocation2 + $0x10] sm:$0xff] }
 0x466   : > { %2068 = vmatprep.subr.bf16.mxu0 %v2067_v37  ;;  %2078 = vmatprep.subr.bf16.mxu1 %v2067_v37 }
 0x467   : > { %v2334_v49 = vpop.eup %2333  ;;  %2070 = vmatpush3.bf16.msra.mxu0 %v2067_v37  ;;  %2086 = vmatpush3.bf16.msra.mxu1 %v2067_v37  ;;  %v1169_v37 = vld [vmem:[#allocation2 + $0x18] sm:$0xff] }
 0x468   : > { %v922_v53 = vpop.xlane.xlu0 %921  ;;  %v959_v54 = vmul.f32 %v2334_v49, %v3211_v27  ;;  %v2336_v31 = vpop.eup %2335 }
 0x469   : > { %2343 = vrcp.f32 %v922_v53  ;;  %v2338_v23 = vpop.eup %2337  ;;  %v960_v30 = vmul.f32 %v2336_v31, %v3205_v51  ;;  %v1170_v31 = vld [vmem:[#allocation2 + $0x20] sm:$0xff] }
 0x46a   : > { %1934 = vmatmul.mubr.f32.vlgmr.msra.gmra.mrb[16].mxu0 %v958_v52  ;;  %v961_v33 = vmul.f32 %v2338_v23, %v3213_v29 }
 0x46b   : > { %1936 = vmatprep.mubr.f32.mxu0 %v959_v54  ;;  %v2340_v32 = vpop.eup %2339  ;;  %v1171_v54 = vld [vmem:[#allocation2 + $0x28] sm:$0xff] }
 0x46c   : > { %v926_v26 = vpop.xlane.xlu0 %925  ;;  %v962_v28 = vmul.f32 %v2340_v32, %v3218_v36 }
 0x46d   : > { %2345 = vrcp.f32 %v926_v26 }
 0x46e   : > { %1937 = vmatmul.mubr.f32.gmra.mrb[18].mxu0 %v960_v30 }
 0x46f   : > { %1939 = vmatprep.mubr.f32.mxu0 %v961_v33  ;;  %v2342_v38 = vpop.eup %2341  ;;  %v1173_v33 = vld [vmem:[#allocation2 + $0x38] sm:$0xff] }
 0x470   : > { %v930_v35 = vpop.xlane.xlu0 %929  ;;  %v964_v42 = vmul.f32 %v2342_v38, %v3222_v44 }
 0x472   : > { %1940 = vmatmul.mubr.f32.gmra.mrb[20].mxu0 %v962_v28 }
 0x473   : > { %v2344_v27 = vpop.eup %2343 }
 0x474   : > { %v934_v39 = vpop.xlane.xlu0 %933  ;;  %v963_v41 = vmul.f32 %v2344_v27, %v3226_v59 }
 0x476   : > { %1942 = vmatprep.mubr.f32.mxu0 %v963_v41  ;;  %v1175_v41 = vld [vmem:[#allocation2 + $0x48] sm:$0xff] }
 0x477   : > { %v2346_v45 = vpop.eup %2345  ;;  %1943 = vmatmul.mubr.f32.gmra.mrb[22].mxu0 %v964_v42  ;;  %v1174_v42 = vld [vmem:[#allocation2 + $0x40] sm:$0xff] }
 0x478   : > { %v938_v51 = vpop.xlane.xlu0 %937  ;;  %v965_v50 = vmul.f32 %v2346_v45, %v3230_v4 }
 0x479   : > { %2347 = vrcp.f32 %v938_v51 }
 0x47a   : > { %1945 = vmatprep.mubr.f32.mxu0 %v965_v50 }
 0x47c   : > { %v940_v29 = vpop.xlane.xlu0 %939 }
 0x47d   : > { %2349 = vrcp.f32 %v940_v29 }
 0x47e   : > { %2351 = vrcp.f32 %v930_v35  ;;  %v1172_v35 = vld [vmem:[#allocation2 + $0x30] sm:$0xff] }
 0x483   : > { %v2348_v55 = vpop.eup %2347 }
 0x484   : > { %v971_v36 = vmul.f32 %v2348_v55, %v3241_v10  ;;  %v1177_v55 = vld [vmem:[#allocation2 + $0x58] sm:$0xff] }
 0x486   : > { %1954 = vmatprep.mubr.f32.mxu1 %v971_v36  ;;  %v1176_v36 = vld [vmem:[#allocation2 + $0x50] sm:$0xff] }
 0x487   : > { %v2350_v56 = vpop.eup %2349 }
 0x488   : > { %v972_v57 = vmul.f32 %v2350_v56, %v3244_v11  ;;  %v2352_v60 = vpop.eup %2351  ;;  %v1182_v11 = vld [vmem:[%s276_s12] sm:$0xff] }
 0x489   : > { %v967_v0 = vmul.f32 %v2352_v60, %v3235_v8  ;;  %1957 = vmatprep.subr.mxu0 %v1182_v11  ;;  %v1178_v60 = vld [vmem:[#allocation2 + $0x60] sm:$0xff] }
 0x48a   : > { %1955 = vmatmul.mubr.f32.vlgmr.msra.gmra.mrb[16].mxu1 %v972_v57  ;;  %1958 = vmatpush3.msra.mxu0 %v1182_v11 }
 0x492   : > { %v928_v44 = vpop.xlane.xlu1 %927 }
 0x493   : > { %2353 = vrcp.f32 %v928_v44 }
 0x494   : > { %2355 = vrcp.f32 %v934_v39 }
 0x496   : > { %v932_v58 = vpop.xlane.xlu1 %931 }
 0x497   : > { %2357 = vrcp.f32 %v932_v58 }
 0x49a   : > { %v936_v59 = vpop.xlane.xlu1 %935 }
 0x49b   : > { %2359 = vrcp.f32 %v936_v59  ;;  %v1179_v59 = vld [vmem:[#allocation2 + $0x68] sm:$0xff] }
 0x49d   : > { %v2354_v61 = vpop.eup %2353 }
 0x49e   : > { %v966_v63 = vmul.f32 %v2354_v61, %v3251_v17  ;;  %v2356_v1 = vpop.eup %2355 }
 0x49f   : > { %v969_v5 = vmul.f32 %v2356_v1, %v3238_v9 }
 0x4a0   : > { %1946 = vmatmul.mubr.f32.gmra.mrb[24].mxu0 %v966_v63 }
 0x4a1   : > { %v2358_v3 = vpop.eup %2357  ;;  %1948 = vmatprep.mubr.f32.mxu0 %v967_v0 }
 0x4a2   : > { %v968_v4 = vmul.f32 %v2358_v3, %v3254_v18  ;;  %v1181_v3 = vld [vmem:[#allocation2 + $0x78] sm:$0xff] }
 0x4a4   : > { %1949 = vmatmul.mubr.f32.gmra.mrb[26].mxu0 %v968_v4  ;;  %v1180_v4 = vld [vmem:[#allocation2 + $0x70] sm:$0xff] }
 0x4a5   : > { %v2360_v7 = vpop.eup %2359  ;;  %1951 = vmatprep.mubr.f32.mxu0 %v969_v5 }
 0x4a6   : > { %v970_v10 = vmul.f32 %v2360_v7, %v3257_v19 }
 0x4a8   : > { %1952 = vmatmul.mubr.f32.gmra.mrb[28].mxu0 %v970_v10 }
 0x53d   : > { %v1935_v46 = vpop.f32.mrb[16].mxu0 }
 0x53e   : > { %v1087_v8 = vpop.f32.mrb[17].mxu0 }
 0x53f   : > { %1959 = vmatprep.mubr.msk.f32.mxu0 %vm598_vm2, %v1087_v8  ;;  %v1703_v8 = vld [vmem:[#allocation9] ss:$0 sm:$0xff] (!%p1702_p8) }
 0x540   : > { %1960 = vmatmul.mubr.msk.f32.vlgmr.msra.gmra.mrb[30].mxu0 %vm598_vm2, %v1935_v46 }
 0x541   : > { %v1938_v12 = vpop.f32.mrb[18].mxu0 }
 0x542   : > { %v1097_v13 = vpop.f32.mrb[19].mxu0 }
 0x543   : > { %1962 = vmatprep.mubr.msk.f32.mxu0 %vm598_vm2, %v1097_v13 }
 0x544   : > { %1963 = vmatmul.mubr.msk.f32.gmra.mrb[32].mxu0 %vm598_vm2, %v1938_v12 }
 0x545   : > { %v1941_v9 = vpop.f32.mrb[20].mxu0 }
 0x546   : > { %v1107_v14 = vpop.f32.mrb[21].mxu0 }
 0x547   : > { %1965 = vmatprep.mubr.msk.f32.mxu0 %vm598_vm2, %v1107_v14 }
 0x548   : > { %1966 = vmatmul.mubr.msk.f32.gmra.mrb[34].mxu0 %vm598_vm2, %v1941_v9 }
 0x54a   : > { %v1944_v15 = vpop.f32.mrb[22].mxu0 }
 0x54b   : > { %v1117_v16 = vpop.f32.mrb[23].mxu0 }
 0x54c   : > { %1968 = vmatprep.mubr.msk.f32.mxu0 %vm598_vm2, %v1117_v16 }
 0x54d   : > { %1969 = vmatmul.mubr.msk.f32.gmra.mrb[36].mxu0 %vm598_vm2, %v1944_v15 }
 0x55d   : > { %v1956_v17 = vpop.f32.mrb[16].mxu1 }
 0x55e   : > { %v1157_v18 = vpop.f32.mrb[17].mxu1 }
 0x573   : > { %v1947_v19 = vpop.f32.mrb[24].mxu0 }
 0x574   : > { %v1127_v62 = vpop.f32.mrb[25].mxu0 }
 0x575   : > { %1971 = vmatprep.mubr.msk.f32.mxu0 %vm598_vm2, %v1127_v62 }
 0x576   : > { %1972 = vmatmul.mubr.msk.f32.gmra.mrb[38].mxu0 %vm598_vm2, %v1947_v19 }
 0x577   : > { %v1950_v2 = vpop.f32.mrb[26].mxu0 }
 0x578   : > { %v1137_v20 = vpop.f32.mrb[27].mxu0 }
 0x579   : > { %1974 = vmatprep.mubr.msk.f32.mxu0 %vm598_vm2, %v1137_v20 }
 0x57a   : > { %1975 = vmatmul.mubr.msk.f32.gmra.mrb[40].mxu0 %vm598_vm2, %v1950_v2 }
 0x57b   : > { %v1953_v6 = vpop.f32.mrb[28].mxu0 }
 0x57c   : > { %v1147_v21 = vpop.f32.mrb[29].mxu0 }
 0x57d   : > { %1977 = vmatprep.mubr.msk.f32.mxu0 %vm598_vm2, %v1147_v21 }
 0x57e   : > { %1978 = vmatmul.mubr.msk.f32.gmra.mrb[42].mxu0 %vm598_vm2, %v1953_v6 }
 0x57f   : > { %1980 = vmatprep.mubr.msk.f32.mxu0 %vm598_vm2, %v1157_v18 }
 0x582   : > { %1981 = vmatmul.mubr.msk.f32.gmra.mrb[44].mxu0 %vm598_vm2, %v1956_v17 }
 0x613   : > { %v1961_v24 = vpop.f32.mrb[30].mxu0 }
 0x614   : > { %v1377_v43 = vadd.f32 %v1961_v24, %v1167_v40  ;;  %v1297_v25 = vpop.f32.mrb[31].mxu0 }
 0x615   : > { %v1376_v34 = vadd.f32 %v1297_v25, %v1166_v22 }
 0x616   : > { %1393 = vst.msk [vmem:[#allocation2 + $0x8] sm:$0xff] %vm356_vm1, %v1377_v43 }
 0x617   : > { %1392 = vst.msk [vmem:[#allocation2] sm:$0xff] %vm356_vm1, %v1376_v34  ;;  %v1964_v48 = vpop.f32.mrb[32].mxu0 }
 0x618   : > { %v1379_v49 = vadd.f32 %v1964_v48, %v1169_v37  ;;  %v1307_v52 = vpop.f32.mrb[33].mxu0 }
 0x619   : > { %v1378_v53 = vadd.f32 %v1307_v52, %v1168_v47 }
 0x61a   : > { %1395 = vst.msk [vmem:[#allocation2 + $0x18] sm:$0xff] %vm356_vm1, %v1379_v49 }
 0x61b   : > { %1394 = vst.msk [vmem:[#allocation2 + $0x10] sm:$0xff] %vm356_vm1, %v1378_v53  ;;  %v1967_v23 = vpop.f32.mrb[34].mxu0 }
 0x61c   : > { %v1381_v26 = vadd.f32 %v1967_v23, %v1171_v54  ;;  %v1317_v30 = vpop.f32.mrb[35].mxu0 }
 0x61d   : > { %v1380_v32 = vadd.f32 %v1317_v30, %v1170_v31  ;;  %v1413_v12 = vld [vmem:[#allocation2 + $0x8] sm:$0xff] (!%p1702_p8) }
 0x61e   : > { %1397 = vst.msk [vmem:[#allocation2 + $0x28] sm:$0xff] %vm356_vm1, %v1381_v26  ;;  %v1412_v46 = vld [vmem:[#allocation2] sm:$0xff] (!%p1702_p8)  ;;  %v1436_v9 = vadd.f32 (!%p1702_p8), %v1703_v8, %v1413_v12 }
 0x61f   : > { %1396 = vst.msk [vmem:[#allocation2 + $0x20] sm:$0xff] %vm356_vm1, %v1380_v32  ;;  %v1435_v13 = vadd.f32 (!%p1702_p8), %v1703_v8, %v1412_v46 }
 0x620   : > { %v1970_v28 = vpop.f32.mrb[36].mxu0  ;;  %1452 = vst.msk [vmem:[%s2976_s13 + $0x8] sm:$0xff] (!%p1702_p8), %vm356_vm1, %v1436_v9 }
 0x621   : > { %v1383_v38 = vadd.f32 %v1970_v28, %v1173_v33  ;;  %v1327_v27 = vpop.f32.mrb[37].mxu0  ;;  %v1415_v15 = vld [vmem:[#allocation2 + $0x18] sm:$0xff] (!%p1702_p8)  ;;  %1451 = vst.msk [vmem:[%s2976_s13] sm:$0xff] (!%p1702_p8), %vm356_vm1, %v1435_v13 }
 0x622   : > { %v1382_v39 = vadd.f32 %v1327_v27, %v1172_v35  ;;  %v1414_v14 = vld [vmem:[#allocation2 + $0x10] sm:$0xff] (!%p1702_p8)  ;;  %v1438_v18 = vadd.f32 (!%p1702_p8), %v1703_v8, %v1415_v15 }
 0x623   : > { %1399 = vst.msk [vmem:[#allocation2 + $0x38] sm:$0xff] %vm356_vm1, %v1383_v38  ;;  %v1437_v17 = vadd.f32 (!%p1702_p8), %v1703_v8, %v1414_v14 }
 0x624   : > { %1398 = vst.msk [vmem:[#allocation2 + $0x30] sm:$0xff] %vm356_vm1, %v1382_v39  ;;  %1454 = vst.msk [vmem:[%s2976_s13 + $0x18] sm:$0xff] (!%p1702_p8), %vm356_vm1, %v1438_v18 }
 0x625   : > { %v1417_v62 = vld [vmem:[#allocation2 + $0x28] sm:$0xff] (!%p1702_p8)  ;;  %1453 = vst.msk [vmem:[%s2976_s13 + $0x10] sm:$0xff] (!%p1702_p8), %vm356_vm1, %v1437_v17 }
 0x626   : > { %v1416_v16 = vld [vmem:[#allocation2 + $0x20] sm:$0xff] (!%p1702_p8)  ;;  %v1440_v6 = vadd.f32 (!%p1702_p8), %v1703_v8, %v1417_v62 }
 0x627   : > { %v1439_v19 = vadd.f32 (!%p1702_p8), %v1703_v8, %v1416_v16 }
 0x628   : > { %1456 = vst.msk [vmem:[%s2976_s13 + $0x28] sm:$0xff] (!%p1702_p8), %vm356_vm1, %v1440_v6 }
 0x629   : > { %1455 = vst.msk [vmem:[%s2976_s13 + $0x20] sm:$0xff] (!%p1702_p8), %vm356_vm1, %v1439_v19 }
 0x62a   : > { %v1419_v20 = vld [vmem:[#allocation2 + $0x38] sm:$0xff] (!%p1702_p8) }
 0x62b   : > { %v1418_v2 = vld [vmem:[#allocation2 + $0x30] sm:$0xff] (!%p1702_p8)  ;;  %v1442_v40 = vadd.f32 (!%p1702_p8), %v1703_v8, %v1419_v20 }
 0x62c   : > { %v1441_v21 = vadd.f32 (!%p1702_p8), %v1703_v8, %v1418_v2 }
 0x62d   : > { %1458 = vst.msk [vmem:[%s2976_s13 + $0x38] sm:$0xff] (!%p1702_p8), %vm356_vm1, %v1442_v40 }
 0x62e   : > { %1457 = vst.msk [vmem:[%s2976_s13 + $0x30] sm:$0xff] (!%p1702_p8), %vm356_vm1, %v1441_v21 }
 0x649   : > { %v1973_v45 = vpop.f32.mrb[38].mxu0 }
 0x64a   : > { %v1385_v51 = vadd.f32 %v1973_v45, %v1175_v41  ;;  %v1337_v50 = vpop.f32.mrb[39].mxu0 }
 0x64b   : > { %v1384_v29 = vadd.f32 %v1337_v50, %v1174_v42 }
 0x64c   : > { %1401 = vst.msk [vmem:[#allocation2 + $0x48] sm:$0xff] %vm356_vm1, %v1385_v51 }
 0x64d   : > { %1400 = vst.msk [vmem:[#allocation2 + $0x40] sm:$0xff] %vm356_vm1, %v1384_v29  ;;  %v1976_v56 = vpop.f32.mrb[40].mxu0 }
 0x64e   : > { %v1387_v57 = vadd.f32 %v1976_v56, %v1177_v55  ;;  %v1347_v44 = vpop.f32.mrb[41].mxu0 }
 0x64f   : > { %v1386_v58 = vadd.f32 %v1347_v44, %v1176_v36 }
 0x650   : > { %1403 = vst.msk [vmem:[#allocation2 + $0x58] sm:$0xff] %vm356_vm1, %v1387_v57 }
 0x651   : > { %1402 = vst.msk [vmem:[#allocation2 + $0x50] sm:$0xff] %vm356_vm1, %v1386_v58  ;;  %v1979_v61 = vpop.f32.mrb[42].mxu0 }
 0x652   : > { %v1389_v63 = vadd.f32 %v1979_v61, %v1179_v59  ;;  %v1357_v0 = vpop.f32.mrb[43].mxu0 }
 0x653   : > { %v1388_v1 = vadd.f32 %v1357_v0, %v1178_v60  ;;  %1411 = sbr.rel (%p1702_p8) target bundleno = 1636 (0x664), region = 60  ;;  %v1421_v24 = vld [vmem:[#allocation2 + $0x48] sm:$0xff] (!%p1702_p8) }
 0x654   : > { %1405 = vst.msk [vmem:[#allocation2 + $0x68] sm:$0xff] %vm356_vm1, %v1389_v63  ;;  %v1420_v22 = vld [vmem:[#allocation2 + $0x40] sm:$0xff] (!%p1702_p8)  ;;  %v1444_v34 = vadd.f32 (!%p1702_p8), %v1703_v8, %v1421_v24 }
 0x655   : > { %1404 = vst.msk [vmem:[#allocation2 + $0x60] sm:$0xff] %vm356_vm1, %v1388_v1  ;;  %v1982_v5 = vpop.f32.mrb[44].mxu0  ;;  %v1443_v25 = vadd.f32 (!%p1702_p8), %v1703_v8, %v1420_v22 }
 0x656   : > { %v1391_v7 = vadd.f32 %v1982_v5, %v1181_v3  ;;  %v1367_v10 = vpop.f32.mrb[45].mxu0  ;;  %1460 = vst.msk [vmem:[%s2976_s13 + $0x48] sm:$0xff] (!%p1702_p8), %vm356_vm1, %v1444_v34 }
 0x657   : > { %v1390_v11 = vadd.f32 %v1367_v10, %v1180_v4  ;;  %v1423_v47 = vld [vmem:[#allocation2 + $0x58] sm:$0xff] (!%p1702_p8)  ;;  %1459 = vst.msk [vmem:[%s2976_s13 + $0x40] sm:$0xff] (!%p1702_p8), %vm356_vm1, %v1443_v25 }
 0x658   : > { %1407 = vst.msk [vmem:[#allocation2 + $0x78] sm:$0xff] %vm356_vm1, %v1391_v7  ;;  %v1422_v43 = vld [vmem:[#allocation2 + $0x50] sm:$0xff] (!%p1702_p8)  ;;  %v1446_v52 = vadd.f32 (!%p1702_p8), %v1703_v8, %v1423_v47 }
 0x659   : > { %1406 = vst.msk [vmem:[#allocation2 + $0x70] sm:$0xff] %vm356_vm1, %v1390_v11  ;;  %v1445_v37 = vadd.f32 (!%p1702_p8), %v1703_v8, %v1422_v43 }
 0x65a   : > { %1462 = vst.msk [vmem:[%s2976_s13 + $0x58] sm:$0xff] %vm356_vm1, %v1446_v52 }
 0x65b   : > { %v1425_v49 = vld [vmem:[#allocation2 + $0x68] sm:$0xff]  ;;  %1461 = vst.msk [vmem:[%s2976_s13 + $0x50] sm:$0xff] %vm356_vm1, %v1445_v37 }
 0x65c   : > { %v1424_v48 = vld [vmem:[#allocation2 + $0x60] sm:$0xff]  ;;  %v1448_v54 = vadd.f32 %v1703_v8, %v1425_v49 }
 0x65d   : > { %v1447_v53 = vadd.f32 %v1703_v8, %v1424_v48 }
 0x65e   : > { %1464 = vst.msk [vmem:[%s2976_s13 + $0x68] sm:$0xff] %vm356_vm1, %v1448_v54 }
 0x65f   : > { %v1427_v23 = vld [vmem:[#allocation2 + $0x78] sm:$0xff]  ;;  %1463 = vst.msk [vmem:[%s2976_s13 + $0x60] sm:$0xff] %vm356_vm1, %v1447_v53 }
 0x660   : > { %v1426_v31 = vld [vmem:[#allocation2 + $0x70] sm:$0xff]  ;;  %v1450_v30 = vadd.f32 %v1703_v8, %v1427_v23 }
 0x661   : > { %v1449_v26 = vadd.f32 %v1703_v8, %v1426_v31 }
 0x662   : > { %1466 = vst.msk [vmem:[%s2976_s13 + $0x78] sm:$0xff] %vm356_vm1, %v1450_v30 }
 0x663   : > { %1465 = vst.msk [vmem:[%s2976_s13 + $0x70] sm:$0xff] %vm356_vm1, %v1449_v26 }
 0x664 PF: > { %s1711_s21 = sshll.u32 %s2597_s22, 11  ;;  %s3479_s18 = sld [smem:[#allocation24_spill]] }
 0x665   : > { %s1481_s24 = sshll.u32 %s2976_s13, 4  ;;  %s1468_s3 = scalar_lea.sflag [#allocation5], %s2949_s8  ;;  %s3350_s24 = int_to_ptr.vmem [resolvable:$true] %s1481_s24 }
 0x666   : > { %s2479_s27 = scalar_lea.vmem %s3350_s24, 2048  ;;  %p3481_p13 = scmp.ne.s32.totalorder %s3452_s15, 0 }
 0x667   : > { %p2480_p7 = scmp.ne.s32.totalorder %s3350_s24, %s2479_s27  ;;  %s2620_s28 = smov [#allocation11]  }
 0x668   : > { %s2483_s30 = sshll.u32 %s2620_s28, 4  ;;  %s2484_s30 = int_to_ptr.vmem [resolvable:$false] %s2483_s30 }
 0x669   : > { %p2481_p0 = pnand %p2480_p7, %p3481_p13  ;;  %s2485_s22 = scalar_lea.vmem %s2484_s30, 4096 }
 0x66a   : > { %s3480_s6 = smov %s3479_s18  ;;  %s3347_s26 = scalar_lea.hbm %s3479_s18, %s1711_s21 }
 0x66b   : > { %p2482_p3 = pneg %p2481_p0  ;;  %p2486_p2 = scmp.lt.s32.totalorder %s3350_s24, %s2484_s30 }
 0x66c   : > { %p2487_p10 = scmp.lt.s32.totalorder %s2485_s22, %s2479_s27 }
 0x66e   : > { %p2488_p11 = por %p2487_p10, %p2486_p2 }
 0x670   : > { %p2489_p1 = pnand %p2488_p11, %p2482_p3 }
 0x672   : > { %2492 = shalt.err (!%p2489_p1)
}
 0x673   : > { %s2493_s9 = scalar_lea.hbm %s3347_s26, 2048  ;;  %s2497_s4 = scalar_lea.hbm %s3480_s6, 4096 }
 0x674   : > { %p2494_p6 = scmp.ne.s32.totalorder %s3347_s26, %s2493_s9  ;;  %p2498_p9 = scmp.lt.u32.totalorder %s3347_s26, %s3480_s6 }
 0x675   : > { %p2499_p12 = scmp.lt.u32.totalorder %s2497_s4, %s2493_s9  ;;  %p2501_p7 = scmp.lt.u32.totalorder %s2493_s9, %s3347_s26 }
 0x676   : > { %p2495_p4 = pnand %p2494_p6, %p3481_p13 }
 0x677   : > { %p2500_p8 = por %p2499_p12, %p2498_p9 }
 0x678   : > { %p2496_p5 = pneg %p2495_p4 }
 0x679   : > { %p2502_p0 = por %p2501_p7, %p2500_p8 }
 0x67b   : > { %p2503_p3 = pnand %p2502_p0, %p2496_p5 }
 0x67d   : > { %2506 = shalt.err (!%p2503_p3)
}
 0x67e   : > { %s2621_s14 = smov 128   ;;  %s2622_s1 = smov 8  }
 0x67f   : > { %2097 = dma.vmem_to_hbm [thread:$0]  (%p3481_p13), %s3350_s24, 2048, %s3347_s26, %s1468_s3, %s2621_s14, %s2621_s14, %s2622_s1  }
 0x680 PF: > { %s3482_s21 = sld [smem:[#allocation16_spill]]  ;;  %s3483_s5 = sld [smem:[#allocation20_spill]] }
 0x681   : > { %p2120_p2 = scmp.ge.s32.totalorder %s2609_s25, 2 }
 0x686   : > { %s1496_s11 = sand.u32 1, %s3482_s21   ;;  %p3484_p10 = scmp.ne.s32.totalorder %s3483_s5, 0 }
 0x687   : > { %s1497_s18 = scalar_lea.sflag [#allocation5], %s1496_s11 }
 0x688   : > { %p2114_p11 = pnand %p2120_p2, %p3484_p10 }
 0x68a   : > { %2564 = dma.done.wait (!%p2114_p11), %s1497_s18, 2048  }
 0x68b   : > { %2566 = vsyncadd (!%p2114_p11), %s1497_s18, 4294965248  ;;  %s24_s25 = sadd.s32 1, %s2609_s25   ;;  %s3485_s27 = sld [smem:[#allocation19_spill]] }
 0x68c   : > { %p21_p1 = scmp.ge.s32.totalorder %s24_s25, 10   ;;  %s3486_s22 = sld [smem:[#allocation17_spill]] }
 0x68d   : > { %s3487_s8 = sld [smem:[#allocation18_spill]]  ;;  %s3488_s24 = sld [smem:[#allocation21_spill]] }
 0x68e   : > { %s3489_s15 = smov %s2573_s16  ;;  %s3490_s16 = smov %s2577_s17 }
 0x68f   : > { %s3492_s18 = smov %s2585_s19  ;;  %s3493_s19 = smov %s2589_s20 }
 0x690   : > { %s3494_s20 = smov %s2883_s29  ;;  %s3495_s21 = smov %s2601_s23 }
 0x691   : > { %s3491_s17 = smov %s3485_s27  ;;  %23 = sbr.rel (!%p21_p1) target bundleno = 16 (0x10), region = 117 }
 0x693   : > { %s3496_s23 = smov %s3487_s8 }
 0x698   :  { %1502 = vsyncpa [#allocation4], 1 }
 0x699   :  { %1504 = vsyncpa [#allocation4 + $0x1], 1 }
 0x69a   :  { %1505 = vsyncpa [#allocation7], 1 }
 0x69b   :  { %1507 = vsyncpa [#allocation7 + $0x1], 1 }
 0x69c   :  { %1508 = vsyncpa [#allocation10], 1 }
 0x69d   :  { %1509 = vsyncpa [#allocation5], 1 }
 0x69e   :  { %1511 = vsyncpa [#allocation5 + $0x1], 1 }

</bundles_post_ra>
